<compile_context>
chip_gen: v7x
topology: tpu7x:2x2x1
jax: 0.10.0
libtpu: 0.0.40
codegen_flags: <defaults>
</compile_context>

<pallas_src>
import functools

import jax
import jax.numpy as jnp
from jax import lax
from jax.experimental import pallas as pl
from jax.experimental.pallas import tpu as pltpu


_LN_EPS = 1e-5


def _round_up(x, m):
    return ((x + m - 1) // m) * m


# -----------------------------------------------------------------------------
# Kernel
# -----------------------------------------------------------------------------
def gradient_transform_kernel(
    u_ref, v_ref,
    w1u_ref, b1u_ref, w2u_ref, b2u_ref,
    w1v_ref, b1v_ref, w2v_ref, b2v_ref,
    out1_ref, out2_ref,
    un_scr, vn_scr, nz_scr, acc1_scr, acc2_scr,
    *, x_dim, delta_dim,
):
    k = pl.program_id(1)
    nk = pl.num_programs(1)

    def ln_rows(x, true_d):
        # Sum-based LN statistics with the true (unpadded) denominator:
        # padded lanes are zero so the sums are exact; the (x - mu)
        # contamination on padded lanes is annihilated by zero W1 rows.
        inv_d = 1.0 / float(true_d)
        mu = jnp.sum(x, axis=-1, keepdims=True) * inv_d
        ex2 = jnp.sum(x * x, axis=-1, keepdims=True) * inv_d
        var = jnp.maximum(ex2 - mu * mu, 0.0)
        x_n = (x - mu) * lax.rsqrt(var + _LN_EPS)
        nz = jnp.max(jnp.abs(x), axis=-1, keepdims=True) > 0.0  # exact torch nz
        return x_n, nz

    @pl.when(k == 0)
    def _init():
        # Sequenced paths: only one (rows, D) f32 intermediate live at a time.
        u = u_ref[...].astype(jnp.float32)
        u_n, nz_u = ln_rows(u, x_dim)
        un_scr[...] = u_n.astype(jnp.bfloat16)
        v = v_ref[...].astype(jnp.float32)
        v_n, nz_v = ln_rows(v, delta_dim)
        vn_scr[...] = v_n.astype(jnp.bfloat16)
        nz_scr[...] = jnp.logical_and(nz_u, nz_v).astype(jnp.float32)
        acc1_scr[...] = jnp.zeros_like(acc1_scr)
        acc2_scr[...] = jnp.zeros_like(acc2_scr)

    # One hidden-dim block of each MLP:
    #   sum_k ReLU(x_n @ W1[:, k] + b1[k]) @ W2[k, :]
    # bf16 MXU operands, f32 accumulation; bias/ReLU in f32 (VPU, v5e-safe).
    h1 = jnp.dot(un_scr[...], w1u_ref[...],
                 preferred_element_type=jnp.float32) + b1u_ref[...]
    h1 = jnp.maximum(h1, 0.0)
    acc1_scr[...] += jnp.dot(h1.astype(jnp.bfloat16), w2u_ref[...],
                             preferred_element_type=jnp.float32)

    h2 = jnp.dot(vn_scr[...], w1v_ref[...],
                 preferred_element_type=jnp.float32) + b1v_ref[...]
    h2 = jnp.maximum(h2, 0.0)
    acc2_scr[...] += jnp.dot(h2.astype(jnp.bfloat16), w2v_ref[...],
                             preferred_element_type=jnp.float32)

    @pl.when(k == nk - 1)
    def _finalize():
        nz = nz_scr[...]
        out1_ref[...] = ((acc1_scr[...] + b2u_ref[...]) * nz).astype(out1_ref.dtype)
        out2_ref[...] = ((acc2_scr[...] + b2v_ref[...]) * nz).astype(out2_ref.dtype)


# -----------------------------------------------------------------------------
# Wrapper
# -----------------------------------------------------------------------------
def _vmem_limit_bytes():
    # Generation-aware VMEM budget: ~80% of per-core capacity (v7x has only
    # 64 MiB, so never hard-code 64 MiB; v5e/v6e get ~100 MiB instead).
    try:
        info = pltpu.get_tpu_info()
        cap = getattr(info, "vmem_capacity_bytes", None)
        if cap is None:
            raise AttributeError("vmem_capacity_bytes")
        return max(32 * 1024 * 1024, int(cap * 0.8))
    except Exception:
        return 48 * 1024 * 1024  # safe on every generation


def gradient_transform(u, v, params, *, tile_rows=None, out_dtype=jnp.float32):
    """u: (..., x_dim), v: (..., delta_dim); `params` from prepare_params().
    Returns (out1, out2) of shapes (N, x_dim), (N, delta_dim),
    N = prod(leading dims).  Rows whose (u, v) pair is entirely zero are
    zeroed (PyTorch drops them; static shapes forbid compaction here)."""
    x_dim = u.shape[-1]
    d_dim = v.shape[-1]
    u_ = u.reshape(-1, x_dim)   # keep native dtype for the DMA
    v_ = v.reshape(-1, d_dim)
    n = u_.shape[0]
    assert v_.shape[0] == n

    w1u, b1u, w2u, b2u = params["w1u"], params["b1u"], params["w2u"], params["b2u"]
    w1v, b1v, w2v, b2v = params["w1v"], params["b1v"], params["w2v"], params["b2v"]
    tile_h = params["tile_h"]

    x_pad, h_pad = w1u.shape
    d_pad = w1v.shape[0]
    xp = w2u.shape[1]
    dp = w2v.shape[1]
    kt = h_pad // tile_h

    # D-adaptive row tile: small D is HBM-bound -> bigger tiles amortize the
    # per-step overhead; large D keeps 256 (256-wide MXU M dim, bounds VMEM).
    if tile_rows is None:
        big = max(x_pad, d_pad)
        tile_rows = 1024 if big <= 512 else (512 if big <= 1024 else 256)
    tile_rows = max(8, min(tile_rows, _round_up(n, 8)))

    n_tiles = pl.cdiv(n, tile_rows)
    n_pad = n_tiles * tile_rows

    # Pad rows (all-zero -> nz mask zeroes them, sliced off below) and feature
    # lanes (lane-dense vld, 128-aligned contraction dim).
    if n_pad != n or x_pad != x_dim:
        u_ = jnp.pad(u_, ((0, n_pad - n), (0, x_pad - x_dim)))
    if n_pad != n or d_pad != d_dim:
        v_ = jnp.pad(v_, ((0, n_pad - n), (0, d_pad - d_dim)))

    kernel = functools.partial(gradient_transform_kernel,
                               x_dim=x_dim, delta_dim=d_dim)

    # Advisory cost estimate (2*M*K*N per matmul, both paths).
    flops = (2 * n_pad * (x_pad * h_pad + h_pad * xp)
             + 2 * n_pad * (d_pad * h_pad + h_pad * dp))
    weight_bytes = sum(int(a.size) * a.dtype.itemsize
                       for a in (w1u, b1u, w2u, b2u, w1v, b1v, w2v, b2v))
    bytes_accessed = (int(u_.size) * u_.dtype.itemsize
                      + int(v_.size) * v_.dtype.itemsize
                      + weight_bytes
                      + n_pad * (xp + dp) * jnp.dtype(out_dtype).itemsize)
    cost = pl.CostEstimate(flops=int(flops), transcendentals=2 * n_pad,
                           bytes_accessed=int(bytes_accessed))

    def build(single_buffer_consts):
        def spec(shape, imap, const):
            if const and single_buffer_consts:
                # Constant index_map -> double-buffering only wastes VMEM.
                return pl.BlockSpec(shape, imap, pipeline_mode=pl.Buffered(1))
            return pl.BlockSpec(shape, imap)

        const_k = (kt == 1)  # with a single hidden block, W1/b1/W2 are constant
        in_specs = [
            pl.BlockSpec((tile_rows, x_pad), lambda i, k: (i, 0)),   # u rows
            pl.BlockSpec((tile_rows, d_pad), lambda i, k: (i, 0)),   # v rows
            spec((x_pad, tile_h), lambda i, k: (0, k), const_k),     # W1u cols
            spec((1, tile_h),     lambda i, k: (0, k), const_k),     # b1u
            spec((tile_h, xp),    lambda i, k: (k, 0), const_k),     # W2u rows
            spec((1, xp),         lambda i, k: (0, 0), True),        # b2u
            spec((d_pad, tile_h), lambda i, k: (0, k), const_k),     # W1v cols
            spec((1, tile_h),     lambda i, k: (0, k), const_k),     # b1v
            spec((tile_h, dp),    lambda i, k: (k, 0), const_k),     # W2v rows
            spec((1, dp),         lambda i, k: (0, 0), True),        # b2v
        ]
        out_specs = [
            pl.BlockSpec((tile_rows, xp), lambda i, k: (i, 0)),
            pl.BlockSpec((tile_rows, dp), lambda i, k: (i, 0)),
        ]
        return pl.pallas_call(
            kernel,
            out_shape=(jax.ShapeDtypeStruct((n_pad, xp), out_dtype),
                       jax.ShapeDtypeStruct((n_pad, dp), out_dtype)),
            grid_spec=pltpu.PrefetchScalarGridSpec(
                num_scalar_prefetch=0,
                grid=(n_tiles, kt),           # rows parallel, hidden reduction
                in_specs=in_specs,
                out_specs=out_specs,
                scratch_shapes=[
                    pltpu.VMEM((tile_rows, x_pad), jnp.bfloat16),   # u_n
                    pltpu.VMEM((tile_rows, d_pad), jnp.bfloat16),   # v_n
                    pltpu.VMEM((tile_rows, 1), jnp.float32),        # nz
                    pltpu.VMEM((tile_rows, xp), jnp.float32),       # acc1
                    pltpu.VMEM((tile_rows, dp), jnp.float32),       # acc2
                ]),
            compiler_params=pltpu.CompilerParams(
                dimension_semantics=("parallel", "arbitrary"),
                vmem_limit_bytes=_vmem_limit_bytes()),
            cost_estimate=cost,
        )

    args = (u_, v_, w1u, b1u, w2u, b2u, w1v, b1v, w2v, b2v)
    try:
        o1, o2 = build(True)(*args)
    except Exception:
        # Portability guard: some jax builds may reject pl.Buffered(1);
        # fall back to default double-buffering (identical semantics).
        o1, o2 = build(False)(*args)

    return o1[:n, :x_dim], o2[:n, :d_dim]


# -----------------------------------------------------------------------------
# Parameter construction / preparation
# -----------------------------------------------------------------------------
def init_raw_params(key, x_dim, delta_dim):
    """Raw module parameters (f32, torch-like shapes): LN gamma/beta and two
    2-layer MLPs.  gamma/beta perturbed from defaults so the affine fold is
    actually exercised."""
    ks = jax.random.split(key, 8)

    def linear(k, fan_in, fan_out):
        scale = (2.0 / (fan_in + fan_out)) ** 0.5
        w = scale * jax.random.normal(k, (fan_in, fan_out), jnp.float32)
        b = jnp.zeros((1, fan_out), jnp.float32)
        return w, b

    w1u, b1u = linear(ks[0], x_dim, 2 * x_dim)
    w2u, b2u = linear(ks[1], 2 * x_dim, x_dim)
    w1v, b1v = linear(ks[2], delta_dim, 2 * delta_dim)
    w2v, b2v = linear(ks[3], 2 * delta_dim, delta_dim)

    gu = 1.0 + 0.1 * jax.random.normal(ks[4], (1, x_dim), jnp.float32)
    bu = 0.1 * jax.random.normal(ks[5], (1, x_dim), jnp.float32)
    gv = 1.0 + 0.1 * jax.random.normal(ks[6], (1, delta_dim), jnp.float32)
    bv = 0.1 * jax.random.normal(ks[7], (1, delta_dim), jnp.float32)

    return (gu, bu, w1u, b1u, w2u, b2u, gv, bv, w1v, b1v, w2v, b2v)


def prepare_params(raw, x_dim, delta_dim, *, tile_h_max=512):
    """Host-side one-time prep:
      * fold LN affine into the first Linear: W1' = diag(gamma) @ W1,
        b1' = beta @ W1 + b1   (done in f32, before the bf16 cast)
      * zero-pad: W1 rows to 128-aligned feature dims; the hidden (2D) dims of
        both paths to a common multiple of tile_h (exact: padded hidden units
        have zero W1 cols / b1 / W2 rows); W2/b2 output columns to 128.
      * cast weights to bf16 (MXU operands); biases stay f32."""
    (gu, bu, w1u, b1u, w2u, b2u, gv, bv, w1v, b1v, w2v, b2v) = raw

    x_pad = _round_up(x_dim, 128)
    d_pad = _round_up(delta_dim, 128)
    h_raw = max(2 * x_dim, 2 * delta_dim)
    h128 = _round_up(h_raw, 128)
    tile_h = min(_round_up(tile_h_max, 128), h128)
    h_pad = _round_up(h128, tile_h)

    def fold(gamma, beta, w1, b1):
        return gamma.reshape(-1, 1) * w1, beta @ w1 + b1

    def pad2(a, rows, cols):
        return jnp.pad(a, ((0, rows - a.shape[0]), (0, cols - a.shape[1])))

    w1u_f, b1u_f = fold(gu, bu, w1u, b1u)
    w1v_f, b1v_f = fold(gv, bv, w1v, b1v)

    bf = lambda w: w.astype(jnp.bfloat16)
    return {
        "w1u": bf(pad2(w1u_f, x_pad, h_pad)),
        "b1u": pad2(b1u_f, 1, h_pad),
        "w2u": bf(pad2(w2u, h_pad, x_pad)),
        "b2u": pad2(b2u, 1, x_pad),
        "w1v": bf(pad2(w1v_f, d_pad, h_pad)),
        "b1v": pad2(b1v_f, 1, h_pad),
        "w2v": bf(pad2(w2v, h_pad, d_pad)),
        "b2v": pad2(b2v, 1, d_pad),
        "tile_h": tile_h,
    }


# -----------------------------------------------------------------------------
# Pure-JAX reference (module semantics, full f32)
# -----------------------------------------------------------------------------
def reference(u, v, raw_params):
    (gu, bu, w1u, b1u, w2u, b2u, gv, bv, w1v, b1v, w2v, b2v) = raw_params
    x_dim, d_dim = u.shape[-1], v.shape[-1]
    u_ = u.reshape(-1, x_dim).astype(jnp.float32)
    v_ = v.reshape(-1, d_dim).astype(jnp.float32)
    nz = (jnp.any(u_ != 0, -1) & jnp.any(v_ != 0, -1)).astype(jnp.float32)[:, None]

    def ln(x, g, b):
        mu = jnp.mean(x, -1, keepdims=True)
        xc = x - mu
        var = jnp.mean(xc * xc, -1, keepdims=True)
        return xc * lax.rsqrt(var + _LN_EPS) * g + b

    def mlp(x, w1, b1, w2, b2):
        h = jnp.maximum(x @ w1 + b1, 0.0)
        return h @ w2 + b2

    o1 = mlp(ln(u_, gu, bu), w1u, b1u, w2u, b2u)
    o2 = mlp(ln(v_, gv, bv), w1v, b1v, w2v, b2v)
    return o1 * nz, o2 * nz


# -----------------------------------------------------------------------------
# Test
# -----------------------------------------------------------------------------
if __name__ == "__main__":
    import numpy as np

    key = jax.random.PRNGKey(0)
    k_u, k_v, k_p = jax.random.split(key, 3)

    batch, seq = 2, 8
    x_dim, delta_dim = 32, 64

    u = jax.random.normal(k_u, (batch, seq, x_dim), jnp.float32)
    v = jax.random.normal(k_v, (batch, seq, delta_dim), jnp.float32)
    # make a couple of rows all-zero to exercise the nz mask
    u = u.at[0, 0].set(0.0)
    v = v.at[0, 0].set(0.0)
    v = v.at[1, 3].set(0.0)

    raw_params = init_raw_params(k_p, x_dim, delta_dim)
    params = prepare_params(raw_params, x_dim, delta_dim)

    out1, out2 = gradient_transform(u, v, params)
    out1, out2 = jax.block_until_ready((out1, out2))

    # f32 reference of the module; relaxed tolerance accounts for bf16 MXU
    # operands (f32 accumulation) in the kernel.
    ref1, ref2 = reference(u, v, raw_params)
    np.testing.assert_allclose(np.asarray(out1), np.asarray(ref1), rtol=2e-2, atol=2e-2)
    np.testing.assert_allclose(np.asarray(out2), np.asarray(ref2), rtol=2e-2, atol=2e-2)

    # zero-row convention check
    assert float(jnp.abs(out1[0]).max()) == 0.0 and float(jnp.abs(out2[0]).max()) == 0.0
    assert float(jnp.abs(out1[seq + 3]).max()) == 0.0 and float(jnp.abs(out2[seq + 3]).max()) == 0.0

    print("KERNEL_OK")
</pallas_src>

<mosaic_0001>
module attributes {stable_mosaic.version = 11 : i64} {
  func.func @gradient_transform_kernel(%arg0: i32, %arg1: i32, %arg2: memref<16x128xf32, #tpu.memory_space<vmem>>, %arg3: memref<16x128xf32, #tpu.memory_space<vmem>>, %arg4: memref<128x128xbf16, #tpu.memory_space<vmem>>, %arg5: memref<1x128xf32, #tpu.memory_space<vmem>>, %arg6: memref<128x128xbf16, #tpu.memory_space<vmem>>, %arg7: memref<1x128xf32, #tpu.memory_space<vmem>>, %arg8: memref<128x128xbf16, #tpu.memory_space<vmem>>, %arg9: memref<1x128xf32, #tpu.memory_space<vmem>>, %arg10: memref<128x128xbf16, #tpu.memory_space<vmem>>, %arg11: memref<1x128xf32, #tpu.memory_space<vmem>>, %arg12: memref<16x128xf32, #tpu.memory_space<vmem>>, %arg13: memref<16x128xf32, #tpu.memory_space<vmem>>, %arg14: memref<16x128xbf16, #tpu.memory_space<vmem>>, %arg15: memref<16x128xbf16, #tpu.memory_space<vmem>>, %arg16: memref<16x1xf32, #tpu.memory_space<vmem>>, %arg17: memref<16x128xf32, #tpu.memory_space<vmem>>, %arg18: memref<16x128xf32, #tpu.memory_space<vmem>>) attributes {dimension_semantics = [#tpu.dimension_semantics<parallel>, #tpu.dimension_semantics<arbitrary>], iteration_bounds = array<i64: 1, 1>, scalar_prefetch = 0 : i64, scratch_operands = 5 : i64, tpu.core_type = #tpu.core_type<tc>, window_params = [{transform_indices = @transform_0, window_bounds = array<i64: 16, 128>}, {transform_indices = @transform_1, window_bounds = array<i64: 16, 128>}, {pipeline_mode = #tpu.pipeline_mode<synchronous>, transform_indices = @transform_2, window_bounds = array<i64: 128, 128>}, {pipeline_mode = #tpu.pipeline_mode<synchronous>, transform_indices = @transform_3, window_bounds = array<i64: 1, 128>}, {pipeline_mode = #tpu.pipeline_mode<synchronous>, transform_indices = @transform_4, window_bounds = array<i64: 128, 128>}, {pipeline_mode = #tpu.pipeline_mode<synchronous>, transform_indices = @transform_5, window_bounds = array<i64: 1, 128>}, {pipeline_mode = #tpu.pipeline_mode<synchronous>, transform_indices = @transform_6, window_bounds = array<i64: 128, 128>}, {pipeline_mode = #tpu.pipeline_mode<synchronous>, transform_indices = @transform_7, window_bounds = array<i64: 1, 128>}, {pipeline_mode = #tpu.pipeline_mode<synchronous>, transform_indices = @transform_8, window_bounds = array<i64: 128, 128>}, {pipeline_mode = #tpu.pipeline_mode<synchronous>, transform_indices = @transform_9, window_bounds = array<i64: 1, 128>}, {transform_indices = @transform_10, window_bounds = array<i64: 16, 128>}, {transform_indices = @transform_11, window_bounds = array<i64: 16, 128>}]} {
    %c0_i32 = arith.constant 0 : i32
    %0 = arith.cmpi eq, %arg1, %c0_i32 : i32
    %1 = arith.extui %0 : i1 to i32
    %c0_i32_0 = arith.constant 0 : i32
    %2 = arith.cmpi ne, %1, %c0_i32_0 : i32
    scf.if %2 {
      %c0_31 = arith.constant 0 : index
      %c0_32 = arith.constant 0 : index
      %34 = vector.load %arg2[%c0_31, %c0_32] : memref<16x128xf32, #tpu.memory_space<vmem>>, vector<16x128xf32>
      %cst_33 = arith.constant dense<0.000000e+00> : vector<16xf32>
      %35 = vector.multi_reduction <add>, %34, %cst_33 [1] : vector<16x128xf32> to vector<16xf32>
      %36 = vector.shape_cast %35 : vector<16xf32> to vector<16x1xf32>
      %cst_34 = arith.constant 3.125000e-02 : f32
      %37 = vector.broadcast %cst_34 : f32 to vector<16x1xf32>
      %38 = arith.mulf %36, %37 : vector<16x1xf32>
      %39 = arith.mulf %34, %34 : vector<16x128xf32>
      %cst_35 = arith.constant dense<0.000000e+00> : vector<16xf32>
      %40 = vector.multi_reduction <add>, %39, %cst_35 [1] : vector<16x128xf32> to vector<16xf32>
      %41 = vector.shape_cast %40 : vector<16xf32> to vector<16x1xf32>
      %cst_36 = arith.constant 3.125000e-02 : f32
      %42 = vector.broadcast %cst_36 : f32 to vector<16x1xf32>
      %43 = arith.mulf %41, %42 : vector<16x1xf32>
      %44 = arith.mulf %38, %38 : vector<16x1xf32>
      %45 = arith.subf %43, %44 : vector<16x1xf32>
      %cst_37 = arith.constant 0.000000e+00 : f32
      %46 = vector.broadcast %cst_37 : f32 to vector<16x1xf32>
      %47 = arith.maximumf %45, %46 : vector<16x1xf32>
      %48 = vector.broadcast %38 : vector<16x1xf32> to vector<16x128xf32>
      %49 = arith.subf %34, %48 : vector<16x128xf32>
      %cst_38 = arith.constant 9.99999974E-6 : f32
      %50 = vector.broadcast %cst_38 : f32 to vector<16x1xf32>
      %51 = arith.addf %47, %50 : vector<16x1xf32>
      %52 = math.rsqrt %51 : vector<16x1xf32>
      %53 = vector.broadcast %52 : vector<16x1xf32> to vector<16x128xf32>
      %54 = arith.mulf %49, %53 : vector<16x128xf32>
      %55 = math.absf %34 : vector<16x128xf32>
      %cst_39 = arith.constant dense<0xFF800000> : vector<16xf32>
      %56 = vector.multi_reduction <maximumf>, %55, %cst_39 [1] : vector<16x128xf32> to vector<16xf32>
      %57 = vector.shape_cast %56 : vector<16xf32> to vector<16x1xf32>
      %cst_40 = arith.constant 0.000000e+00 : f32
      %58 = vector.broadcast %cst_40 : f32 to vector<16x1xf32>
      %59 = arith.cmpf ogt, %57, %58 : vector<16x1xf32>
      %60 = arith.truncf %54 : vector<16x128xf32> to vector<16x128xbf16>
      %c0_41 = arith.constant 0 : index
      %c0_42 = arith.constant 0 : index
      %61 = vector.load %arg14[%c0_41, %c0_42] : memref<16x128xbf16, #tpu.memory_space<vmem>>, vector<16x128xbf16>
      tpu.vector_store %arg14[%c0_41, %c0_42], %60 {strides = array<i32>} : memref<16x128xbf16, #tpu.memory_space<vmem>>, vector<16x128xbf16>,
      %c0_43 = arith.constant 0 : index
      %c0_44 = arith.constant 0 : index
      %62 = vector.load %arg3[%c0_43, %c0_44] : memref<16x128xf32, #tpu.memory_space<vmem>>, vector<16x128xf32>
      %cst_45 = arith.constant dense<0.000000e+00> : vector<16xf32>
      %63 = vector.multi_reduction <add>, %62, %cst_45 [1] : vector<16x128xf32> to vector<16xf32>
      %64 = vector.shape_cast %63 : vector<16xf32> to vector<16x1xf32>
      %cst_46 = arith.constant 1.562500e-02 : f32
      %65 = vector.broadcast %cst_46 : f32 to vector<16x1xf32>
      %66 = arith.mulf %64, %65 : vector<16x1xf32>
      %67 = arith.mulf %62, %62 : vector<16x128xf32>
      %cst_47 = arith.constant dense<0.000000e+00> : vector<16xf32>
      %68 = vector.multi_reduction <add>, %67, %cst_47 [1] : vector<16x128xf32> to vector<16xf32>
      %69 = vector.shape_cast %68 : vector<16xf32> to vector<16x1xf32>
      %cst_48 = arith.constant 1.562500e-02 : f32
      %70 = vector.broadcast %cst_48 : f32 to vector<16x1xf32>
      %71 = arith.mulf %69, %70 : vector<16x1xf32>
      %72 = arith.mulf %66, %66 : vector<16x1xf32>
      %73 = arith.subf %71, %72 : vector<16x1xf32>
      %cst_49 = arith.constant 0.000000e+00 : f32
      %74 = vector.broadcast %cst_49 : f32 to vector<16x1xf32>
      %75 = arith.maximumf %73, %74 : vector<16x1xf32>
      %76 = vector.broadcast %66 : vector<16x1xf32> to vector<16x128xf32>
      %77 = arith.subf %62, %76 : vector<16x128xf32>
      %cst_50 = arith.constant 9.99999974E-6 : f32
      %78 = vector.broadcast %cst_50 : f32 to vector<16x1xf32>
      %79 = arith.addf %75, %78 : vector<16x1xf32>
      %80 = math.rsqrt %79 : vector<16x1xf32>
      %81 = vector.broadcast %80 : vector<16x1xf32> to vector<16x128xf32>
      %82 = arith.mulf %77, %81 : vector<16x128xf32>
      %83 = math.absf %62 : vector<16x128xf32>
      %cst_51 = arith.constant dense<0xFF800000> : vector<16xf32>
      %84 = vector.multi_reduction <maximumf>, %83, %cst_51 [1] : vector<16x128xf32> to vector<16xf32>
      %85 = vector.shape_cast %84 : vector<16xf32> to vector<16x1xf32>
      %cst_52 = arith.constant 0.000000e+00 : f32
      %86 = vector.broadcast %cst_52 : f32 to vector<16x1xf32>
      %87 = arith.cmpf ogt, %85, %86 : vector<16x1xf32>
      %88 = arith.truncf %82 : vector<16x128xf32> to vector<16x128xbf16>
      %c0_53 = arith.constant 0 : index
      %c0_54 = arith.constant 0 : index
      %89 = vector.load %arg15[%c0_53, %c0_54] : memref<16x128xbf16, #tpu.memory_space<vmem>>, vector<16x128xbf16>
      tpu.vector_store %arg15[%c0_53, %c0_54], %88 {strides = array<i32>} : memref<16x128xbf16, #tpu.memory_space<vmem>>, vector<16x128xbf16>,
      %90 = arith.andi %59, %87 : vector<16x1xi1>
      %91 = arith.extui %90 : vector<16x1xi1> to vector<16x1xi32>
      %92 = arith.sitofp %91 : vector<16x1xi32> to vector<16x1xf32>
      %c0_55 = arith.constant 0 : index
      %c0_56 = arith.constant 0 : index
      %93 = vector.load %arg16[%c0_55, %c0_56] : memref<16x1xf32, #tpu.memory_space<vmem>>, vector<16x1xf32>
      tpu.vector_store %arg16[%c0_55, %c0_56], %92 {strides = array<i32>} : memref<16x1xf32, #tpu.memory_space<vmem>>, vector<16x1xf32>,
      %cst_57 = arith.constant 0.000000e+00 : f32
      %94 = vector.broadcast %cst_57 : f32 to vector<16x128xf32>
      %c0_58 = arith.constant 0 : index
      %c0_59 = arith.constant 0 : index
      %95 = vector.load %arg17[%c0_58, %c0_59] : memref<16x128xf32, #tpu.memory_space<vmem>>, vector<16x128xf32>
      tpu.vector_store %arg17[%c0_58, %c0_59], %94 {strides = array<i32>} : memref<16x128xf32, #tpu.memory_space<vmem>>, vector<16x128xf32>,
      %cst_60 = arith.constant 0.000000e+00 : f32
      %96 = vector.broadcast %cst_60 : f32 to vector<16x128xf32>
      %c0_61 = arith.constant 0 : index
      %c0_62 = arith.constant 0 : index
      %97 = vector.load %arg18[%c0_61, %c0_62] : memref<16x128xf32, #tpu.memory_space<vmem>>, vector<16x128xf32>
      tpu.vector_store %arg18[%c0_61, %c0_62], %96 {strides = array<i32>} : memref<16x128xf32, #tpu.memory_space<vmem>>, vector<16x128xf32>,
    } else {
    }
    %c0 = arith.constant 0 : index
    %c0_1 = arith.constant 0 : index
    %3 = vector.load %arg14[%c0, %c0_1] : memref<16x128xbf16, #tpu.memory_space<vmem>>, vector<16x128xbf16>
    %c0_2 = arith.constant 0 : index
    %c0_3 = arith.constant 0 : index
    %4 = vector.load %arg4[%c0_2, %c0_3] : memref<128x128xbf16, #tpu.memory_space<vmem>>, vector<128x128xbf16>
    %cst = arith.constant dense<0.000000e+00> : vector<16x128xf32>
    %5 = tpu.matmul %3, %4, %cst {dimension_numbers = #tpu.dot_dimension_numbers<[1], [0], [0], [1], [0, 0, 1, 1], [], []>} : vector<16x128xbf16>, vector<128x128xbf16>, vector<16x128xf32> -> vector<16x128xf32>
    %c0_4 = arith.constant 0 : index
    %c0_5 = arith.constant 0 : index
    %6 = vector.load %arg5[%c0_4, %c0_5] : memref<1x128xf32, #tpu.memory_space<vmem>>, vector<1x128xf32>
    %7 = vector.broadcast %6 : vector<1x128xf32> to vector<16x128xf32>
    %8 = arith.addf %5, %7 : vector<16x128xf32>
    %cst_6 = arith.constant 0.000000e+00 : f32
    %9 = vector.broadcast %cst_6 : f32 to vector<16x128xf32>
    %10 = arith.maximumf %8, %9 : vector<16x128xf32>
    %c0_7 = arith.constant 0 : index
    %c0_8 = arith.constant 0 : index
    %11 = vector.load %arg17[%c0_7, %c0_8] : memref<16x128xf32, #tpu.memory_space<vmem>>, vector<16x128xf32>
    %12 = arith.truncf %10 : vector<16x128xf32> to vector<16x128xbf16>
    %c0_9 = arith.constant 0 : index
    %c0_10 = arith.constant 0 : index
    %13 = vector.load %arg6[%c0_9, %c0_10] : memref<128x128xbf16, #tpu.memory_space<vmem>>, vector<128x128xbf16>
    %cst_11 = arith.constant dense<0.000000e+00> : vector<16x128xf32>
    %14 = tpu.matmul %12, %13, %cst_11 {dimension_numbers = #tpu.dot_dimension_numbers<[1], [0], [0], [1], [0, 0, 1, 1], [], []>} : vector<16x128xbf16>, vector<128x128xbf16>, vector<16x128xf32> -> vector<16x128xf32>
    %15 = arith.addf %11, %14 : vector<16x128xf32>
    %c0_12 = arith.constant 0 : index
    %c0_13 = arith.constant 0 : index
    %16 = vector.load %arg17[%c0_12, %c0_13] : memref<16x128xf32, #tpu.memory_space<vmem>>, vector<16x128xf32>
    tpu.vector_store %arg17[%c0_12, %c0_13], %15 {strides = array<i32>} : memref<16x128xf32, #tpu.memory_space<vmem>>, vector<16x128xf32>,
    %c0_14 = arith.constant 0 : index
    %c0_15 = arith.constant 0 : index
    %17 = vector.load %arg15[%c0_14, %c0_15] : memref<16x128xbf16, #tpu.memory_space<vmem>>, vector<16x128xbf16>
    %c0_16 = arith.constant 0 : index
    %c0_17 = arith.constant 0 : index
    %18 = vector.load %arg8[%c0_16, %c0_17] : memref<128x128xbf16, #tpu.memory_space<vmem>>, vector<128x128xbf16>
    %cst_18 = arith.constant dense<0.000000e+00> : vector<16x128xf32>
    %19 = tpu.matmul %17, %18, %cst_18 {dimension_numbers = #tpu.dot_dimension_numbers<[1], [0], [0], [1], [0, 0, 1, 1], [], []>} : vector<16x128xbf16>, vector<128x128xbf16>, vector<16x128xf32> -> vector<16x128xf32>
    %c0_19 = arith.constant 0 : index
    %c0_20 = arith.constant 0 : index
    %20 = vector.load %arg9[%c0_19, %c0_20] : memref<1x128xf32, #tpu.memory_space<vmem>>, vector<1x128xf32>
    %21 = vector.broadcast %20 : vector<1x128xf32> to vector<16x128xf32>
    %22 = arith.addf %19, %21 : vector<16x128xf32>
    %cst_21 = arith.constant 0.000000e+00 : f32
    %23 = vector.broadcast %cst_21 : f32 to vector<16x128xf32>
    %24 = arith.maximumf %22, %23 : vector<16x128xf32>
    %c0_22 = arith.constant 0 : index
    %c0_23 = arith.constant 0 : index
    %25 = vector.load %arg18[%c0_22, %c0_23] : memref<16x128xf32, #tpu.memory_space<vmem>>, vector<16x128xf32>
    %26 = arith.truncf %24 : vector<16x128xf32> to vector<16x128xbf16>
    %c0_24 = arith.constant 0 : index
    %c0_25 = arith.constant 0 : index
    %27 = vector.load %arg10[%c0_24, %c0_25] : memref<128x128xbf16, #tpu.memory_space<vmem>>, vector<128x128xbf16>
    %cst_26 = arith.constant dense<0.000000e+00> : vector<16x128xf32>
    %28 = tpu.matmul %26, %27, %cst_26 {dimension_numbers = #tpu.dot_dimension_numbers<[1], [0], [0], [1], [0, 0, 1, 1], [], []>} : vector<16x128xbf16>, vector<128x128xbf16>, vector<16x128xf32> -> vector<16x128xf32>
    %29 = arith.addf %25, %28 : vector<16x128xf32>
    %c0_27 = arith.constant 0 : index
    %c0_28 = arith.constant 0 : index
    %30 = vector.load %arg18[%c0_27, %c0_28] : memref<16x128xf32, #tpu.memory_space<vmem>>, vector<16x128xf32>
    tpu.vector_store %arg18[%c0_27, %c0_28], %29 {strides = array<i32>} : memref<16x128xf32, #tpu.memory_space<vmem>>, vector<16x128xf32>,
    %c0_i32_29 = arith.constant 0 : i32
    %31 = arith.cmpi eq, %arg1, %c0_i32_29 : i32
    %32 = arith.extui %31 : i1 to i32
    %c0_i32_30 = arith.constant 0 : i32
    %33 = arith.cmpi ne, %32, %c0_i32_30 : i32
    scf.if %33 {
      %c0_31 = arith.constant 0 : index
      %c0_32 = arith.constant 0 : index
      %34 = vector.load %arg16[%c0_31, %c0_32] : memref<16x1xf32, #tpu.memory_space<vmem>>, vector<16x1xf32>
      %c0_33 = arith.constant 0 : index
      %c0_34 = arith.constant 0 : index
      %35 = vector.load %arg17[%c0_33, %c0_34] : memref<16x128xf32, #tpu.memory_space<vmem>>, vector<16x128xf32>
      %c0_35 = arith.constant 0 : index
      %c0_36 = arith.constant 0 : index
      %36 = vector.load %arg7[%c0_35, %c0_36] : memref<1x128xf32, #tpu.memory_space<vmem>>, vector<1x128xf32>
      %37 = vector.broadcast %36 : vector<1x128xf32> to vector<16x128xf32>
      %38 = arith.addf %35, %37 : vector<16x128xf32>
      %39 = vector.broadcast %34 : vector<16x1xf32> to vector<16x128xf32>
      %40 = arith.mulf %38, %39 : vector<16x128xf32>
      %c0_37 = arith.constant 0 : index
      %c0_38 = arith.constant 0 : index
      %41 = vector.load %arg12[%c0_37, %c0_38] : memref<16x128xf32, #tpu.memory_space<vmem>>, vector<16x128xf32>
      tpu.vector_store %arg12[%c0_37, %c0_38], %40 {strides = array<i32>} : memref<16x128xf32, #tpu.memory_space<vmem>>, vector<16x128xf32>,
      %c0_39 = arith.constant 0 : index
      %c0_40 = arith.constant 0 : index
      %42 = vector.load %arg18[%c0_39, %c0_40] : memref<16x128xf32, #tpu.memory_space<vmem>>, vector<16x128xf32>
      %c0_41 = arith.constant 0 : index
      %c0_42 = arith.constant 0 : index
      %43 = vector.load %arg11[%c0_41, %c0_42] : memref<1x128xf32, #tpu.memory_space<vmem>>, vector<1x128xf32>
      %44 = vector.broadcast %43 : vector<1x128xf32> to vector<16x128xf32>
      %45 = arith.addf %42, %44 : vector<16x128xf32>
      %46 = vector.broadcast %34 : vector<16x1xf32> to vector<16x128xf32>
      %47 = arith.mulf %45, %46 : vector<16x128xf32>
      %c0_43 = arith.constant 0 : index
      %c0_44 = arith.constant 0 : index
      %48 = vector.load %arg13[%c0_43, %c0_44] : memref<16x128xf32, #tpu.memory_space<vmem>>, vector<16x128xf32>
      tpu.vector_store %arg13[%c0_43, %c0_44], %47 {strides = array<i32>} : memref<16x128xf32, #tpu.memory_space<vmem>>, vector<16x128xf32>,
    } else {
    }
    return
  }
  func.func @transform_0(%arg0: i32, %arg1: i32) -> (i32, i32) {
    %c0_i32 = arith.constant 0 : i32
    %c0_i32_0 = arith.constant 0 : i32
    return %arg0, %c0_i32 : i32, i32
  }
  func.func @transform_1(%arg0: i32, %arg1: i32) -> (i32, i32) {
    %c0_i32 = arith.constant 0 : i32
    %c0_i32_0 = arith.constant 0 : i32
    return %arg0, %c0_i32 : i32, i32
  }
  func.func @transform_2(%arg0: i32, %arg1: i32) -> (i32, i32) {
    %c0_i32 = arith.constant 0 : i32
    %c0_i32_0 = arith.constant 0 : i32
    return %c0_i32, %arg1 : i32, i32
  }
  func.func @transform_3(%arg0: i32, %arg1: i32) -> (i32, i32) {
    %c0_i32 = arith.constant 0 : i32
    %c0_i32_0 = arith.constant 0 : i32
    return %c0_i32, %arg1 : i32, i32
  }
  func.func @transform_4(%arg0: i32, %arg1: i32) -> (i32, i32) {
    %c0_i32 = arith.constant 0 : i32
    %c0_i32_0 = arith.constant 0 : i32
    return %arg1, %c0_i32 : i32, i32
  }
  func.func @transform_5(%arg0: i32, %arg1: i32) -> (i32, i32) {
    %c0_i32 = arith.constant 0 : i32
    %c0_i32_0 = arith.constant 0 : i32
    %c0_i32_1 = arith.constant 0 : i32
    return %c0_i32, %c0_i32_0 : i32, i32
  }
  func.func @transform_6(%arg0: i32, %arg1: i32) -> (i32, i32) {
    %c0_i32 = arith.constant 0 : i32
    %c0_i32_0 = arith.constant 0 : i32
    return %c0_i32, %arg1 : i32, i32
  }
  func.func @transform_7(%arg0: i32, %arg1: i32) -> (i32, i32) {
    %c0_i32 = arith.constant 0 : i32
    %c0_i32_0 = arith.constant 0 : i32
    return %c0_i32, %arg1 : i32, i32
  }
  func.func @transform_8(%arg0: i32, %arg1: i32) -> (i32, i32) {
    %c0_i32 = arith.constant 0 : i32
    %c0_i32_0 = arith.constant 0 : i32
    return %arg1, %c0_i32 : i32, i32
  }
  func.func @transform_9(%arg0: i32, %arg1: i32) -> (i32, i32) {
    %c0_i32 = arith.constant 0 : i32
    %c0_i32_0 = arith.constant 0 : i32
    %c0_i32_1 = arith.constant 0 : i32
    return %c0_i32, %c0_i32_0 : i32, i32
  }
  func.func @transform_10(%arg0: i32, %arg1: i32) -> (i32, i32) {
    %c0_i32 = arith.constant 0 : i32
    %c0_i32_0 = arith.constant 0 : i32
    return %arg0, %c0_i32 : i32, i32
  }
  func.func @transform_11(%arg0: i32, %arg1: i32) -> (i32, i32) {
    %c0_i32 = arith.constant 0 : i32
    %c0_i32_0 = arith.constant 0 : i32
    return %arg0, %c0_i32 : i32, i32
  }
}

module attributes {stable_mosaic.version = 11 : i64} {
  func.func @gradient_transform_kernel(%arg0: i32, %arg1: i32, %arg2: memref<16x128xf32, #tpu.memory_space<vmem>>, %arg3: memref<16x128xf32, #tpu.memory_space<vmem>>, %arg4: memref<128x128xbf16, #tpu.memory_space<vmem>>, %arg5: memref<1x128xf32, #tpu.memory_space<vmem>>, %arg6: memref<128x128xbf16, #tpu.memory_space<vmem>>, %arg7: memref<1x128xf32, #tpu.memory_space<vmem>>, %arg8: memref<128x128xbf16, #tpu.memory_space<vmem>>, %arg9: memref<1x128xf32, #tpu.memory_space<vmem>>, %arg10: memref<128x128xbf16, #tpu.memory_space<vmem>>, %arg11: memref<1x128xf32, #tpu.memory_space<vmem>>, %arg12: memref<16x128xf32, #tpu.memory_space<vmem>>, %arg13: memref<16x128xf32, #tpu.memory_space<vmem>>, %arg14: memref<16x128xbf16, #tpu.memory_space<vmem>>, %arg15: memref<16x128xbf16, #tpu.memory_space<vmem>>, %arg16: memref<16x1xf32, #tpu.memory_space<vmem>>, %arg17: memref<16x128xf32, #tpu.memory_space<vmem>>, %arg18: memref<16x128xf32, #tpu.memory_space<vmem>>) attributes {dimension_semantics = [#tpu.dimension_semantics<parallel>, #tpu.dimension_semantics<arbitrary>], iteration_bounds = array<i64: 1, 1>, scalar_prefetch = 0 : i64, scratch_operands = 5 : i64, tpu.core_type = #tpu.core_type<tc>, window_params = [{transform_indices = @transform_0, window_bounds = array<i64: 16, 128>}, {transform_indices = @transform_1, window_bounds = array<i64: 16, 128>}, {transform_indices = @transform_2, window_bounds = array<i64: 128, 128>}, {transform_indices = @transform_3, window_bounds = array<i64: 1, 128>}, {transform_indices = @transform_4, window_bounds = array<i64: 128, 128>}, {pipeline_mode = #tpu.pipeline_mode<synchronous>, transform_indices = @transform_5, window_bounds = array<i64: 1, 128>}, {transform_indices = @transform_6, window_bounds = array<i64: 128, 128>}, {transform_indices = @transform_7, window_bounds = array<i64: 1, 128>}, {transform_indices = @transform_8, window_bounds = array<i64: 128, 128>}, {pipeline_mode = #tpu.pipeline_mode<synchronous>, transform_indices = @transform_9, window_bounds = array<i64: 1, 128>}, {transform_indices = @transform_10, window_bounds = array<i64: 16, 128>}, {transform_indices = @transform_11, window_bounds = array<i64: 16, 128>}]} {
    %c0_i32 = arith.constant 0 : i32
    %0 = arith.cmpi eq, %arg1, %c0_i32 : i32
    %1 = arith.extui %0 : i1 to i32
    %c0_i32_0 = arith.constant 0 : i32
    %2 = arith.cmpi ne, %1, %c0_i32_0 : i32
    scf.if %2 {
      %c0_31 = arith.constant 0 : index
      %c0_32 = arith.constant 0 : index
      %34 = vector.load %arg2[%c0_31, %c0_32] : memref<16x128xf32, #tpu.memory_space<vmem>>, vector<16x128xf32>
      %cst_33 = arith.constant dense<0.000000e+00> : vector<16xf32>
      %35 = vector.multi_reduction <add>, %34, %cst_33 [1] : vector<16x128xf32> to vector<16xf32>
      %36 = vector.shape_cast %35 : vector<16xf32> to vector<16x1xf32>
      %cst_34 = arith.constant 3.125000e-02 : f32
      %37 = vector.broadcast %cst_34 : f32 to vector<16x1xf32>
      %38 = arith.mulf %36, %37 : vector<16x1xf32>
      %39 = arith.mulf %34, %34 : vector<16x128xf32>
      %cst_35 = arith.constant dense<0.000000e+00> : vector<16xf32>
      %40 = vector.multi_reduction <add>, %39, %cst_35 [1] : vector<16x128xf32> to vector<16xf32>
      %41 = vector.shape_cast %40 : vector<16xf32> to vector<16x1xf32>
      %cst_36 = arith.constant 3.125000e-02 : f32
      %42 = vector.broadcast %cst_36 : f32 to vector<16x1xf32>
      %43 = arith.mulf %41, %42 : vector<16x1xf32>
      %44 = arith.mulf %38, %38 : vector<16x1xf32>
      %45 = arith.subf %43, %44 : vector<16x1xf32>
      %cst_37 = arith.constant 0.000000e+00 : f32
      %46 = vector.broadcast %cst_37 : f32 to vector<16x1xf32>
      %47 = arith.maximumf %45, %46 : vector<16x1xf32>
      %48 = vector.broadcast %38 : vector<16x1xf32> to vector<16x128xf32>
      %49 = arith.subf %34, %48 : vector<16x128xf32>
      %cst_38 = arith.constant 9.99999974E-6 : f32
      %50 = vector.broadcast %cst_38 : f32 to vector<16x1xf32>
      %51 = arith.addf %47, %50 : vector<16x1xf32>
      %52 = math.rsqrt %51 : vector<16x1xf32>
      %53 = vector.broadcast %52 : vector<16x1xf32> to vector<16x128xf32>
      %54 = arith.mulf %49, %53 : vector<16x128xf32>
      %55 = math.absf %34 : vector<16x128xf32>
      %cst_39 = arith.constant dense<0xFF800000> : vector<16xf32>
      %56 = vector.multi_reduction <maximumf>, %55, %cst_39 [1] : vector<16x128xf32> to vector<16xf32>
      %57 = vector.shape_cast %56 : vector<16xf32> to vector<16x1xf32>
      %cst_40 = arith.constant 0.000000e+00 : f32
      %58 = vector.broadcast %cst_40 : f32 to vector<16x1xf32>
      %59 = arith.cmpf ogt, %57, %58 : vector<16x1xf32>
      %60 = arith.truncf %54 : vector<16x128xf32> to vector<16x128xbf16>
      %c0_41 = arith.constant 0 : index
      %c0_42 = arith.constant 0 : index
      %61 = vector.load %arg14[%c0_41, %c0_42] : memref<16x128xbf16, #tpu.memory_space<vmem>>, vector<16x128xbf16>
      tpu.vector_store %arg14[%c0_41, %c0_42], %60 {strides = array<i32>} : memref<16x128xbf16, #tpu.memory_space<vmem>>, vector<16x128xbf16>,
      %c0_43 = arith.constant 0 : index
      %c0_44 = arith.constant 0 : index
      %62 = vector.load %arg3[%c0_43, %c0_44] : memref<16x128xf32, #tpu.memory_space<vmem>>, vector<16x128xf32>
      %cst_45 = arith.constant dense<0.000000e+00> : vector<16xf32>
      %63 = vector.multi_reduction <add>, %62, %cst_45 [1] : vector<16x128xf32> to vector<16xf32>
      %64 = vector.shape_cast %63 : vector<16xf32> to vector<16x1xf32>
      %cst_46 = arith.constant 1.562500e-02 : f32
      %65 = vector.broadcast %cst_46 : f32 to vector<16x1xf32>
      %66 = arith.mulf %64, %65 : vector<16x1xf32>
      %67 = arith.mulf %62, %62 : vector<16x128xf32>
      %cst_47 = arith.constant dense<0.000000e+00> : vector<16xf32>
      %68 = vector.multi_reduction <add>, %67, %cst_47 [1] : vector<16x128xf32> to vector<16xf32>
      %69 = vector.shape_cast %68 : vector<16xf32> to vector<16x1xf32>
      %cst_48 = arith.constant 1.562500e-02 : f32
      %70 = vector.broadcast %cst_48 : f32 to vector<16x1xf32>
      %71 = arith.mulf %69, %70 : vector<16x1xf32>
      %72 = arith.mulf %66, %66 : vector<16x1xf32>
      %73 = arith.subf %71, %72 : vector<16x1xf32>
      %cst_49 = arith.constant 0.000000e+00 : f32
      %74 = vector.broadcast %cst_49 : f32 to vector<16x1xf32>
      %75 = arith.maximumf %73, %74 : vector<16x1xf32>
      %76 = vector.broadcast %66 : vector<16x1xf32> to vector<16x128xf32>
      %77 = arith.subf %62, %76 : vector<16x128xf32>
      %cst_50 = arith.constant 9.99999974E-6 : f32
      %78 = vector.broadcast %cst_50 : f32 to vector<16x1xf32>
      %79 = arith.addf %75, %78 : vector<16x1xf32>
      %80 = math.rsqrt %79 : vector<16x1xf32>
      %81 = vector.broadcast %80 : vector<16x1xf32> to vector<16x128xf32>
      %82 = arith.mulf %77, %81 : vector<16x128xf32>
      %83 = math.absf %62 : vector<16x128xf32>
      %cst_51 = arith.constant dense<0xFF800000> : vector<16xf32>
      %84 = vector.multi_reduction <maximumf>, %83, %cst_51 [1] : vector<16x128xf32> to vector<16xf32>
      %85 = vector.shape_cast %84 : vector<16xf32> to vector<16x1xf32>
      %cst_52 = arith.constant 0.000000e+00 : f32
      %86 = vector.broadcast %cst_52 : f32 to vector<16x1xf32>
      %87 = arith.cmpf ogt, %85, %86 : vector<16x1xf32>
      %88 = arith.truncf %82 : vector<16x128xf32> to vector<16x128xbf16>
      %c0_53 = arith.constant 0 : index
      %c0_54 = arith.constant 0 : index
      %89 = vector.load %arg15[%c0_53, %c0_54] : memref<16x128xbf16, #tpu.memory_space<vmem>>, vector<16x128xbf16>
      tpu.vector_store %arg15[%c0_53, %c0_54], %88 {strides = array<i32>} : memref<16x128xbf16, #tpu.memory_space<vmem>>, vector<16x128xbf16>,
      %90 = arith.andi %59, %87 : vector<16x1xi1>
      %91 = arith.extui %90 : vector<16x1xi1> to vector<16x1xi32>
      %92 = arith.sitofp %91 : vector<16x1xi32> to vector<16x1xf32>
      %c0_55 = arith.constant 0 : index
      %c0_56 = arith.constant 0 : index
      %93 = vector.load %arg16[%c0_55, %c0_56] : memref<16x1xf32, #tpu.memory_space<vmem>>, vector<16x1xf32>
      tpu.vector_store %arg16[%c0_55, %c0_56], %92 {strides = array<i32>} : memref<16x1xf32, #tpu.memory_space<vmem>>, vector<16x1xf32>,
      %cst_57 = arith.constant 0.000000e+00 : f32
      %94 = vector.broadcast %cst_57 : f32 to vector<16x128xf32>
      %c0_58 = arith.constant 0 : index
      %c0_59 = arith.constant 0 : index
      %95 = vector.load %arg17[%c0_58, %c0_59] : memref<16x128xf32, #tpu.memory_space<vmem>>, vector<16x128xf32>
      tpu.vector_store %arg17[%c0_58, %c0_59], %94 {strides = array<i32>} : memref<16x128xf32, #tpu.memory_space<vmem>>, vector<16x128xf32>,
      %cst_60 = arith.constant 0.000000e+00 : f32
      %96 = vector.broadcast %cst_60 : f32 to vector<16x128xf32>
      %c0_61 = arith.constant 0 : index
      %c0_62 = arith.constant 0 : index
      %97 = vector.load %arg18[%c0_61, %c0_62] : memref<16x128xf32, #tpu.memory_space<vmem>>, vector<16x128xf32>
      tpu.vector_store %arg18[%c0_61, %c0_62], %96 {strides = array<i32>} : memref<16x128xf32, #tpu.memory_space<vmem>>, vector<16x128xf32>,
    } else {
    }
    %c0 = arith.constant 0 : index
    %c0_1 = arith.constant 0 : index
    %3 = vector.load %arg14[%c0, %c0_1] : memref<16x128xbf16, #tpu.memory_space<vmem>>, vector<16x128xbf16>
    %c0_2 = arith.constant 0 : index
    %c0_3 = arith.constant 0 : index
    %4 = vector.load %arg4[%c0_2, %c0_3] : memref<128x128xbf16, #tpu.memory_space<vmem>>, vector<128x128xbf16>
    %cst = arith.constant dense<0.000000e+00> : vector<16x128xf32>
    %5 = tpu.matmul %3, %4, %cst {dimension_numbers = #tpu.dot_dimension_numbers<[1], [0], [0], [1], [0, 0, 1, 1], [], []>} : vector<16x128xbf16>, vector<128x128xbf16>, vector<16x128xf32> -> vector<16x128xf32>
    %c0_4 = arith.constant 0 : index
    %c0_5 = arith.constant 0 : index
    %6 = vector.load %arg5[%c0_4, %c0_5] : memref<1x128xf32, #tpu.memory_space<vmem>>, vector<1x128xf32>
    %7 = vector.broadcast %6 : vector<1x128xf32> to vector<16x128xf32>
    %8 = arith.addf %5, %7 : vector<16x128xf32>
    %cst_6 = arith.constant 0.000000e+00 : f32
    %9 = vector.broadcast %cst_6 : f32 to vector<16x128xf32>
    %10 = arith.maximumf %8, %9 : vector<16x128xf32>
    %c0_7 = arith.constant 0 : index
    %c0_8 = arith.constant 0 : index
    %11 = vector.load %arg17[%c0_7, %c0_8] : memref<16x128xf32, #tpu.memory_space<vmem>>, vector<16x128xf32>
    %12 = arith.truncf %10 : vector<16x128xf32> to vector<16x128xbf16>
    %c0_9 = arith.constant 0 : index
    %c0_10 = arith.constant 0 : index
    %13 = vector.load %arg6[%c0_9, %c0_10] : memref<128x128xbf16, #tpu.memory_space<vmem>>, vector<128x128xbf16>
    %cst_11 = arith.constant dense<0.000000e+00> : vector<16x128xf32>
    %14 = tpu.matmul %12, %13, %cst_11 {dimension_numbers = #tpu.dot_dimension_numbers<[1], [0], [0], [1], [0, 0, 1, 1], [], []>} : vector<16x128xbf16>, vector<128x128xbf16>, vector<16x128xf32> -> vector<16x128xf32>
    %15 = arith.addf %11, %14 : vector<16x128xf32>
    %c0_12 = arith.constant 0 : index
    %c0_13 = arith.constant 0 : index
    %16 = vector.load %arg17[%c0_12, %c0_13] : memref<16x128xf32, #tpu.memory_space<vmem>>, vector<16x128xf32>
    tpu.vector_store %arg17[%c0_12, %c0_13], %15 {strides = array<i32>} : memref<16x128xf32, #tpu.memory_space<vmem>>, vector<16x128xf32>,
    %c0_14 = arith.constant 0 : index
    %c0_15 = arith.constant 0 : index
    %17 = vector.load %arg15[%c0_14, %c0_15] : memref<16x128xbf16, #tpu.memory_space<vmem>>, vector<16x128xbf16>
    %c0_16 = arith.constant 0 : index
    %c0_17 = arith.constant 0 : index
    %18 = vector.load %arg8[%c0_16, %c0_17] : memref<128x128xbf16, #tpu.memory_space<vmem>>, vector<128x128xbf16>
    %cst_18 = arith.constant dense<0.000000e+00> : vector<16x128xf32>
    %19 = tpu.matmul %17, %18, %cst_18 {dimension_numbers = #tpu.dot_dimension_numbers<[1], [0], [0], [1], [0, 0, 1, 1], [], []>} : vector<16x128xbf16>, vector<128x128xbf16>, vector<16x128xf32> -> vector<16x128xf32>
    %c0_19 = arith.constant 0 : index
    %c0_20 = arith.constant 0 : index
    %20 = vector.load %arg9[%c0_19, %c0_20] : memref<1x128xf32, #tpu.memory_space<vmem>>, vector<1x128xf32>
    %21 = vector.broadcast %20 : vector<1x128xf32> to vector<16x128xf32>
    %22 = arith.addf %19, %21 : vector<16x128xf32>
    %cst_21 = arith.constant 0.000000e+00 : f32
    %23 = vector.broadcast %cst_21 : f32 to vector<16x128xf32>
    %24 = arith.maximumf %22, %23 : vector<16x128xf32>
    %c0_22 = arith.constant 0 : index
    %c0_23 = arith.constant 0 : index
    %25 = vector.load %arg18[%c0_22, %c0_23] : memref<16x128xf32, #tpu.memory_space<vmem>>, vector<16x128xf32>
    %26 = arith.truncf %24 : vector<16x128xf32> to vector<16x128xbf16>
    %c0_24 = arith.constant 0 : index
    %c0_25 = arith.constant 0 : index
    %27 = vector.load %arg10[%c0_24, %c0_25] : memref<128x128xbf16, #tpu.memory_space<vmem>>, vector<128x128xbf16>
    %cst_26 = arith.constant dense<0.000000e+00> : vector<16x128xf32>
    %28 = tpu.matmul %26, %27, %cst_26 {dimension_numbers = #tpu.dot_dimension_numbers<[1], [0], [0], [1], [0, 0, 1, 1], [], []>} : vector<16x128xbf16>, vector<128x128xbf16>, vector<16x128xf32> -> vector<16x128xf32>
    %29 = arith.addf %25, %28 : vector<16x128xf32>
    %c0_27 = arith.constant 0 : index
    %c0_28 = arith.constant 0 : index
    %30 = vector.load %arg18[%c0_27, %c0_28] : memref<16x128xf32, #tpu.memory_space<vmem>>, vector<16x128xf32>
    tpu.vector_store %arg18[%c0_27, %c0_28], %29 {strides = array<i32>} : memref<16x128xf32, #tpu.memory_space<vmem>>, vector<16x128xf32>,
    %c0_i32_29 = arith.constant 0 : i32
    %31 = arith.cmpi eq, %arg1, %c0_i32_29 : i32
    %32 = arith.extui %31 : i1 to i32
    %c0_i32_30 = arith.constant 0 : i32
    %33 = arith.cmpi ne, %32, %c0_i32_30 : i32
    scf.if %33 {
      %c0_31 = arith.constant 0 : index
      %c0_32 = arith.constant 0 : index
      %34 = vector.load %arg16[%c0_31, %c0_32] : memref<16x1xf32, #tpu.memory_space<vmem>>, vector<16x1xf32>
      %c0_33 = arith.constant 0 : index
      %c0_34 = arith.constant 0 : index
      %35 = vector.load %arg17[%c0_33, %c0_34] : memref<16x128xf32, #tpu.memory_space<vmem>>, vector<16x128xf32>
      %c0_35 = arith.constant 0 : index
      %c0_36 = arith.constant 0 : index
      %36 = vector.load %arg7[%c0_35, %c0_36] : memref<1x128xf32, #tpu.memory_space<vmem>>, vector<1x128xf32>
      %37 = vector.broadcast %36 : vector<1x128xf32> to vector<16x128xf32>
      %38 = arith.addf %35, %37 : vector<16x128xf32>
      %39 = vector.broadcast %34 : vector<16x1xf32> to vector<16x128xf32>
      %40 = arith.mulf %38, %39 : vector<16x128xf32>
      %c0_37 = arith.constant 0 : index
      %c0_38 = arith.constant 0 : index
      %41 = vector.load %arg12[%c0_37, %c0_38] : memref<16x128xf32, #tpu.memory_space<vmem>>, vector<16x128xf32>
      tpu.vector_store %arg12[%c0_37, %c0_38], %40 {strides = array<i32>} : memref<16x128xf32, #tpu.memory_space<vmem>>, vector<16x128xf32>,
      %c0_39 = arith.constant 0 : index
      %c0_40 = arith.constant 0 : index
      %42 = vector.load %arg18[%c0_39, %c0_40] : memref<16x128xf32, #tpu.memory_space<vmem>>, vector<16x128xf32>
      %c0_41 = arith.constant 0 : index
      %c0_42 = arith.constant 0 : index
      %43 = vector.load %arg11[%c0_41, %c0_42] : memref<1x128xf32, #tpu.memory_space<vmem>>, vector<1x128xf32>
      %44 = vector.broadcast %43 : vector<1x128xf32> to vector<16x128xf32>
      %45 = arith.addf %42, %44 : vector<16x128xf32>
      %46 = vector.broadcast %34 : vector<16x1xf32> to vector<16x128xf32>
      %47 = arith.mulf %45, %46 : vector<16x128xf32>
      %c0_43 = arith.constant 0 : index
      %c0_44 = arith.constant 0 : index
      %48 = vector.load %arg13[%c0_43, %c0_44] : memref<16x128xf32, #tpu.memory_space<vmem>>, vector<16x128xf32>
      tpu.vector_store %arg13[%c0_43, %c0_44], %47 {strides = array<i32>} : memref<16x128xf32, #tpu.memory_space<vmem>>, vector<16x128xf32>,
    } else {
    }
    return
  }
  func.func @transform_0(%arg0: i32, %arg1: i32) -> (i32, i32) {
    %c0_i32 = arith.constant 0 : i32
    %c0_i32_0 = arith.constant 0 : i32
    return %arg0, %c0_i32 : i32, i32
  }
  func.func @transform_1(%arg0: i32, %arg1: i32) -> (i32, i32) {
    %c0_i32 = arith.constant 0 : i32
    %c0_i32_0 = arith.constant 0 : i32
    return %arg0, %c0_i32 : i32, i32
  }
  func.func @transform_2(%arg0: i32, %arg1: i32) -> (i32, i32) {
    %c0_i32 = arith.constant 0 : i32
    %c0_i32_0 = arith.constant 0 : i32
    return %c0_i32, %arg1 : i32, i32
  }
  func.func @transform_3(%arg0: i32, %arg1: i32) -> (i32, i32) {
    %c0_i32 = arith.constant 0 : i32
    %c0_i32_0 = arith.constant 0 : i32
    return %c0_i32, %arg1 : i32, i32
  }
  func.func @transform_4(%arg0: i32, %arg1: i32) -> (i32, i32) {
    %c0_i32 = arith.constant 0 : i32
    %c0_i32_0 = arith.constant 0 : i32
    return %arg1, %c0_i32 : i32, i32
  }
  func.func @transform_5(%arg0: i32, %arg1: i32) -> (i32, i32) {
    %c0_i32 = arith.constant 0 : i32
    %c0_i32_0 = arith.constant 0 : i32
    %c0_i32_1 = arith.constant 0 : i32
    return %c0_i32, %c0_i32_0 : i32, i32
  }
  func.func @transform_6(%arg0: i32, %arg1: i32) -> (i32, i32) {
    %c0_i32 = arith.constant 0 : i32
    %c0_i32_0 = arith.constant 0 : i32
    return %c0_i32, %arg1 : i32, i32
  }
  func.func @transform_7(%arg0: i32, %arg1: i32) -> (i32, i32) {
    %c0_i32 = arith.constant 0 : i32
    %c0_i32_0 = arith.constant 0 : i32
    return %c0_i32, %arg1 : i32, i32
  }
  func.func @transform_8(%arg0: i32, %arg1: i32) -> (i32, i32) {
    %c0_i32 = arith.constant 0 : i32
    %c0_i32_0 = arith.constant 0 : i32
    return %arg1, %c0_i32 : i32, i32
  }
  func.func @transform_9(%arg0: i32, %arg1: i32) -> (i32, i32) {
    %c0_i32 = arith.constant 0 : i32
    %c0_i32_0 = arith.constant 0 : i32
    %c0_i32_1 = arith.constant 0 : i32
    return %c0_i32, %c0_i32_0 : i32, i32
  }
  func.func @transform_10(%arg0: i32, %arg1: i32) -> (i32, i32) {
    %c0_i32 = arith.constant 0 : i32
    %c0_i32_0 = arith.constant 0 : i32
    return %arg0, %c0_i32 : i32, i32
  }
  func.func @transform_11(%arg0: i32, %arg1: i32) -> (i32, i32) {
    %c0_i32 = arith.constant 0 : i32
    %c0_i32_0 = arith.constant 0 : i32
    return %arg0, %c0_i32 : i32, i32
  }
}

</mosaic_0001>

<bundles_post_ra>
// kernel: tpu_custom_call.1
= control target key start
LH: loop header
LB: loop body
LE: loop exit
PB: predicated region body
PF: predicated region fallthrough
CT: control target
= control target key end

     0   :  { %17 = vsyncpa [#allocation8], 0  ;;  %s1430_s0 = inlined_call_operand.hbm [shape: f32[16,128], index: 0, kind: input, shape index: {}]   ;;  %s1431_s1 = inlined_call_operand.hbm [shape: f32[16,128], index: 1, kind: input, shape index: {}]   ;;  %s1432_s2 = inlined_call_operand.hbm [shape: bf16[128,128], index: 2, kind: input, shape index: {}]   ;;  %s1433_s3 = inlined_call_operand.vmem [shape: f32[1,128], index: 3, kind: input, shape index: {}]   ;;  %s1434_s4 = inlined_call_operand.hbm [shape: bf16[128,128], index: 4, kind: input, shape index: {}]   ;;  %s1435_s5 = inlined_call_operand.vmem [shape: f32[1,128], index: 5, kind: input, shape index: {}]   ;;  %s1436_s6 = inlined_call_operand.hbm [shape: bf16[128,128], index: 6, kind: input, shape index: {}]   ;;  %s1437_s7 = inlined_call_operand.vmem [shape: f32[1,128], index: 7, kind: input, shape index: {}]   ;;  %s1438_s8 = inlined_call_operand.hbm [shape: bf16[128,128], index: 8, kind: input, shape index: {}]   ;;  %s1439_s9 = inlined_call_operand.vmem [shape: f32[1,128], index: 9, kind: input, shape index: {}]   ;;  %s1440_s10 = inlined_call_operand.hbm [shape: f32[16,128], index: 10, kind: output, shape index: {0}]   ;;  %s1441_s11 = inlined_call_operand.hbm [shape: f32[16,128], index: 11, kind: output, shape index: {1}]  }
   0x1   :  { %18 = vsyncpa [#allocation11], 0 }
   0x2   :  { %19 = vsyncpa [#allocation14], 0 }
   0x3   :  { %20 = vsyncpa [#allocation17], 0 }
   0x4   :  { %21 = vsyncpa [#allocation9], 0 }
   0x5   :  { %22 = vsyncpa [#allocation20], 0  ;;  %s1153_s17 = smov [#allocation10]   ;;  %s965_s21 = scalar_lea.hbm %s1431_s1, 256 }
   0x6   :  { %s40_s18 = sshll.u32 %s1153_s17, 4  ;;  %p966_p0 = scmp.ne.s32.totalorder %s1431_s1, %s965_s21  ;;  %s41_s18 = int_to_ptr.vmem [resolvable:$true] %s40_s18 }
   0x7   :  { %p969_p1 = scmp.lt.u32.totalorder %s965_s21, %s1431_s1 }
   0x9   :  { %p971_p2 = pnand %p969_p1, %p966_p0 }
   0xb   :  { %974 = shalt.err (!%p971_p2)
}
   0xc   :  { %s975_s26 = scalar_lea.vmem %s41_s18, 256  ;;  %p980_p4 = scmp.lt.s32.totalorder %s41_s18, %s41_s18 }
   0xd   :  { %p976_p3 = scmp.ne.s32.totalorder %s41_s18, %s975_s26  ;;  %p981_p5 = scmp.lt.s32.totalorder %s975_s26, %s975_s26 }
   0xf   :  { %p982_p6 = por %p981_p5, %p980_p4 }
  0x11   :  { %p983_p7 = pnand %p982_p6, %p976_p3 }
  0x13   :  { %986 = shalt.err (!%p983_p7)
}
  0x14   :  { %s1154_s27 = smov 128   ;;  %s1155_s28 = smov 8  }
  0x15   :  { %46 = dma.hbm_to_vmem [thread:$0]  %s1431_s1, 256, %s41_s18, [#allocation11], %s1154_s27, %s1154_s27, %s1155_s28  }
  0x16   :  { %s1156_s12 = smov [#allocation13]   ;;  %s1157_s14 = smov [#allocation7]  }
  0x17   :  { %s66_s13 = sshll.u32 %s1156_s12, 4  ;;  %s28_s15 = sshll.u32 %s1157_s14, 4  ;;  %s67_s13 = int_to_ptr.vmem [resolvable:$true] %s66_s13  ;;  %s29_s15 = int_to_ptr.vmem [resolvable:$true] %s28_s15 }
  0x18   :  { %s987_s19 = scalar_lea.hbm %s1434_s4, 1024 }
  0x19   :  { %p988_p8 = scmp.ne.s32.totalorder %s1434_s4, %s987_s19  ;;  %p991_p9 = scmp.lt.u32.totalorder %s987_s19, %s1434_s4 }
  0x1b   :  { %p993_p10 = pnand %p991_p9, %p988_p8 }
  0x1d   :  { %996 = shalt.err (!%p993_p10)
}
  0x1e   :  { %s997_s1 = scalar_lea.vmem %s67_s13, 1024  ;;  %p1002_p12 = scmp.lt.s32.totalorder %s67_s13, %s67_s13 }
  0x1f   :  { %p998_p11 = scmp.ne.s32.totalorder %s67_s13, %s997_s1  ;;  %p1003_p13 = scmp.lt.s32.totalorder %s997_s1, %s997_s1 }
  0x21   :  { %p1004_p0 = por %p1003_p13, %p1002_p12 }
  0x23   :  { %p1005_p1 = pnand %p1004_p0, %p998_p11 }
  0x25   :  { %1008 = shalt.err (!%p1005_p1)
}
  0x26   :  { %s1158_s18 = smov 64   ;;  %s1159_s24 = smov 4  }
  0x27   :  { %72 = dma.hbm_to_vmem [thread:$0]  %s1434_s4, 1024, %s67_s13, [#allocation14], %s1158_s18, %s1158_s18, %s1159_s24  }
  0x28   :  { %s1009_s12 = scalar_lea.hbm %s1430_s0, 256 }
  0x29   :  { %p1010_p2 = scmp.ne.s32.totalorder %s1430_s0, %s1009_s12  ;;  %p1013_p3 = scmp.lt.u32.totalorder %s1009_s12, %s1430_s0 }
  0x2b   :  { %p1015_p4 = pnand %p1013_p3, %p1010_p2 }
  0x2d   :  { %1018 = shalt.err (!%p1015_p4)
}
  0x2e   :  { %s1019_s20 = scalar_lea.vmem %s29_s15, 256  ;;  %p1024_p6 = scmp.lt.s32.totalorder %s29_s15, %s29_s15 }
  0x2f   :  { %p1020_p5 = scmp.ne.s32.totalorder %s29_s15, %s1019_s20  ;;  %p1025_p7 = scmp.lt.s32.totalorder %s1019_s20, %s1019_s20 }
  0x31   :  { %p1026_p8 = por %p1025_p7, %p1024_p6 }
  0x33   :  { %p1027_p9 = pnand %p1026_p8, %p1020_p5 }
  0x35   :  { %1030 = shalt.err (!%p1027_p9)
}
  0x36   :  { %34 = dma.hbm_to_vmem [thread:$0]  %s1430_s0, 256, %s29_s15, [#allocation8], %s1154_s27, %s1154_s27, %s1155_s28  }
  0x37   :  { %s1160_s21 = smov [#allocation12]   ;;  %s1161_s23 = smov [#allocation15]  }
  0x38   :  { %s52_s22 = sshll.u32 %s1160_s21, 4  ;;  %s80_s1 = sshll.u32 %s1161_s23, 4  ;;  %s53_s22 = int_to_ptr.vmem [resolvable:$true] %s52_s22  ;;  %s81_s1 = int_to_ptr.vmem [resolvable:$true] %s80_s1 }
  0x39   :  { %s1031_s29 = scalar_lea.hbm %s1432_s2, 1024 }
  0x3a   :  { %p1032_p10 = scmp.ne.s32.totalorder %s1432_s2, %s1031_s29  ;;  %p1035_p11 = scmp.lt.u32.totalorder %s1031_s29, %s1432_s2 }
  0x3c   :  { %p1037_p12 = pnand %p1035_p11, %p1032_p10 }
  0x3e   :  { %1040 = shalt.err (!%p1037_p12)
}
  0x3f   :  { %s1041_s0 = scalar_lea.vmem %s53_s22, 1024  ;;  %p1046_p0 = scmp.lt.s32.totalorder %s53_s22, %s53_s22 }
  0x40   :  { %p1042_p13 = scmp.ne.s32.totalorder %s53_s22, %s1041_s0  ;;  %p1047_p1 = scmp.lt.s32.totalorder %s1041_s0, %s1041_s0 }
  0x42   :  { %p1048_p2 = por %p1047_p1, %p1046_p0 }
  0x44   :  { %p1049_p3 = pnand %p1048_p2, %p1042_p13 }
  0x46   :  { %1052 = shalt.err (!%p1049_p3)
}
  0x47   :  { %58 = dma.hbm_to_vmem [thread:$0]  %s1432_s2, 1024, %s53_s22, [#allocation11], %s1158_s18, %s1158_s18, %s1159_s24  }
  0x48   :  { %s1053_s4 = scalar_lea.hbm %s1436_s6, 1024 }
  0x49   :  { %p1054_p4 = scmp.ne.s32.totalorder %s1436_s6, %s1053_s4  ;;  %p1057_p5 = scmp.lt.u32.totalorder %s1053_s4, %s1436_s6 }
  0x4b   :  { %p1059_p6 = pnand %p1057_p5, %p1054_p4 }
  0x4d   :  { %1062 = shalt.err (!%p1059_p6)
}
  0x4e   :  { %s1063_s26 = scalar_lea.vmem %s81_s1, 1024  ;;  %p1068_p8 = scmp.lt.s32.totalorder %s81_s1, %s81_s1 }
  0x4f   :  { %p1064_p7 = scmp.ne.s32.totalorder %s81_s1, %s1063_s26  ;;  %p1069_p9 = scmp.lt.s32.totalorder %s1063_s26, %s1063_s26 }
  0x51   :  { %p1070_p10 = por %p1069_p9, %p1068_p8 }
  0x53   :  { %p1071_p11 = pnand %p1070_p10, %p1064_p7 }
  0x55   :  { %1074 = shalt.err (!%p1071_p11)
}
  0x56   :  { %86 = dma.hbm_to_vmem [thread:$0]  %s1436_s6, 1024, %s81_s1, [#allocation14], %s1158_s18, %s1158_s18, %s1159_s24  }
  0x57   :  { %s1162_s29 = smov [#allocation16]   ;;  %s1075_s16 = scalar_lea.hbm %s1438_s8, 1024 }
  0x58   :  { %s94_s30 = sshll.u32 %s1162_s29, 4  ;;  %p1076_p12 = scmp.ne.s32.totalorder %s1438_s8, %s1075_s16  ;;  %s95_s30 = int_to_ptr.vmem [resolvable:$true] %s94_s30 }
  0x59   :  { %p1079_p13 = scmp.lt.u32.totalorder %s1075_s16, %s1438_s8 }
  0x5b   :  { %p1081_p0 = pnand %p1079_p13, %p1076_p12 }
  0x5d   :  { %1084 = shalt.err (!%p1081_p0)
}
  0x5e   :  { %s1085_s20 = scalar_lea.vmem %s95_s30, 1024  ;;  %p1090_p2 = scmp.lt.s32.totalorder %s95_s30, %s95_s30 }
  0x5f   :  { %p1086_p1 = scmp.ne.s32.totalorder %s95_s30, %s1085_s20  ;;  %p1091_p3 = scmp.lt.s32.totalorder %s1085_s20, %s1085_s20 }
  0x61   :  { %p1092_p4 = por %p1091_p3, %p1090_p2 }
  0x63   :  { %p1093_p5 = pnand %p1092_p4, %p1086_p1 }
  0x65   :  { %1096 = shalt.err (!%p1093_p5)
}
  0x66   :  { %100 = dma.hbm_to_vmem [thread:$0]  %s1438_s8, 1024, %s95_s30, [#allocation17], %s1158_s18, %s1158_s18, %s1159_s24  }
  0x67   :  { %1141 = dma.done.wait [#allocation8], 256  }
  0x68   :  { %1142 = vsyncadd [#allocation8], 4294967040 }
  0x69   :  { %1143 = dma.done.wait [#allocation11], 1280  }
  0x6a   :  { %1144 = vsyncadd [#allocation11], 4294966016 }
  0x6b   :  { %1145 = dma.done.wait [#allocation14], 2048  }
  0x6c   :  { %1146 = vsyncadd [#allocation14], 4294965248 }
  0x6d   :  { %1147 = dma.done.wait [#allocation17], 1024  }
  0x6e   :  { %1148 = vsyncadd [#allocation17], 4294966272  ;;  %v1163_v0 = vmov 0.0   ;;  %v1320_v1 = vld [vmem:[#allocation7] sm:$0xff]  ;;  %v1322_v2 = vld [vmem:[#allocation7 + $0x8] sm:$0xff]  ;;  %vm1164_vm0 = vmmov 0  }
  0x6f   :  { %828 = vmatprep.subr.bf16.mxu0 %v1163_v0  ;;  %848 = vmatprep.subr.bf16.mxu1 %v1163_v0  ;;  %v134_v3 = vmul.f32 %v1320_v1, %v1320_v1  ;;  %v925_v4 = vld [vmem:[#allocation12] sm:$0xff]   ;;  %v135_v5 = vmul.f32 %v1322_v2, %v1322_v2  ;;  %v1329_v6 = vld [vmem:[#allocation10] sm:$0xff]  ;;  %v1333_v7 = vld [vmem:[#allocation10 + $0x8] sm:$0xff]  ;;  %v156_v17 = vand.u32 2147483647, %v1320_v1  ;;  %vm212_vm3 = vcmask 7168  }
  0x70   :  { %128 = vadd.xlane.f32.xlu0 %v1320_v1  ;;  %829 = vmatpush3.bf16.msra.mxu0 %v925_v4  ;;  %v174_v8 = vmul.f32 %v1329_v6, %v1329_v6  ;;  %v175_v9 = vmul.f32 %v1333_v7, %v1333_v7  ;;  %v926_v10 = vld [vmem:[#allocation12 + $0x8] sm:$0xff]   ;;  %v927_v11 = vld [vmem:[#allocation12 + $0x10] sm:$0xff]   ;;  %v928_v12 = vld [vmem:[#allocation12 + $0x18] sm:$0xff]   ;;  %v157_v18 = vand.u32 2147483647, %v1322_v2  ;;  %s1166_s13 = smov [#allocation18]  }
  0x71   :  { %136 = vadd.xlane.f32.xlu1 %v134_v3  ;;  %830 = vmatprep.subr.bf16.mxu0 %v1163_v0  ;;  %v929_v13 = vld [vmem:[#allocation12 + $0x20] sm:$0xff]   ;;  %v930_v14 = vld [vmem:[#allocation12 + $0x28] sm:$0xff]   ;;  %v931_v15 = vld [vmem:[#allocation12 + $0x30] sm:$0xff]   ;;  %v196_v20 = vand.u32 2147483647, %v1329_v6  ;;  %s723_s21 = sshll.u32 %s1166_s13, 4  ;;  %s724_s21 = int_to_ptr.vmem [resolvable:$true] %s723_s21 }
  0x72   :  { %v932_v16 = vld [vmem:[#allocation12 + $0x38] sm:$0xff]   ;;  %844 = vmatprep.mubr.msk.bf16.mxu0 %vm1164_vm0, %v1163_v0  ;;  %864 = vmatprep.mubr.msk.bf16.mxu1 %vm1164_vm0, %v1163_v0  ;;  %v941_v19 = vld [vmem:[#allocation13] sm:$0xff]   ;;  %v197_v21 = vand.u32 2147483647, %v1333_v7  ;;  %v942_v22 = vld [vmem:[#allocation13 + $0x8] sm:$0xff]   ;;  %s1097_s23 = scalar_lea.vmem %s724_s21, 256  ;;  %p1102_p7 = scmp.lt.s32.totalorder %s724_s21, %s724_s21 }
  0x73   :  { %849 = vmatpush3.bf16.msra.mxu1 %v941_v19  ;;  %v943_v23 = vld [vmem:[#allocation13 + $0x10] sm:$0xff]   ;;  %v944_v24 = vld [vmem:[#allocation13 + $0x18] sm:$0xff]   ;;  %v945_v25 = vld [vmem:[#allocation13 + $0x20] sm:$0xff]   ;;  %p1098_p6 = scmp.ne.s32.totalorder %s724_s21, %s1097_s23  ;;  %p1103_p8 = scmp.lt.s32.totalorder %s1097_s23, %s1097_s23 }
  0x74   :  { %130 = vadd.xlane.f32.xlu0 %v1322_v2  ;;  %831 = vmatpush3.bf16.msra.mxu0 %v926_v10  ;;  %v946_v26 = vld [vmem:[#allocation13 + $0x28] sm:$0xff]   ;;  %v933_v59 = vld [vmem:[#allocation15] sm:$0xff]   ;;  %v935_v3 = vld [vmem:[#allocation15 + $0x10] sm:$0xff]  }
  0x75   :  { %138 = vadd.xlane.f32.xlu1 %v135_v5  ;;  %832 = vmatprep.subr.bf16.mxu0 %v1163_v0  ;;  %v934_v63 = vld [vmem:[#allocation15 + $0x8] sm:$0xff]   ;;  %p1104_p9 = por %p1103_p8, %p1102_p7 }
  0x76   :  { %850 = vmatprep.subr.bf16.mxu1 %v1163_v0  ;;  %v938_v10 = vld [vmem:[#allocation15 + $0x28] sm:$0xff]  }
  0x77   :  { %851 = vmatpush3.bf16.msra.mxu1 %v942_v22  ;;  %v1165_v22 = vmov 0   ;;  %p1105_p10 = pnand %p1104_p9, %p1098_p6 }
  0x78   :  { %168 = vadd.xlane.f32.xlu0 %v1329_v6  ;;  %833 = vmatpush3.bf16.msra.mxu0 %v927_v11  ;;  %v939_v11 = vld [vmem:[#allocation15 + $0x30] sm:$0xff]  }
  0x79   :  { %170 = vadd.xlane.f32.xlu1 %v1333_v7  ;;  %834 = vmatprep.subr.bf16.mxu0 %v1163_v0 }
  0x7a   :  { %852 = vmatprep.subr.bf16.mxu1 %v1163_v0  ;;  %923 = vset.pattern.permute.xlu0 %v1165_v22 }
  0x7b   :  { %853 = vmatpush3.bf16.msra.mxu1 %v943_v23  ;;  %924 = vset.pattern.permute.xlu1 %v1165_v22 }
  0x7c   :  { %176 = vadd.xlane.f32.xlu0 %v174_v8  ;;  %835 = vmatpush3.bf16.msra.mxu0 %v928_v12  ;;  %v936_v8 = vld [vmem:[#allocation15 + $0x18] sm:$0xff]  }
  0x7d   :  { %178 = vadd.xlane.f32.xlu1 %v175_v9  ;;  %836 = vmatprep.subr.bf16.mxu0 %v1163_v0  ;;  %v937_v9 = vld [vmem:[#allocation15 + $0x20] sm:$0xff]  }
  0x7e   :  { %854 = vmatprep.subr.bf16.mxu1 %v1163_v0 }
  0x7f   :  { %855 = vmatpush3.bf16.msra.mxu1 %v944_v24 }
  0x80   :  { %837 = vmatpush3.bf16.msra.mxu0 %v929_v13  ;;  %158 = vmax.xlane.f32.xlu0 %v156_v17 }
  0x81   :  { %838 = vmatprep.subr.bf16.mxu0 %v1163_v0  ;;  %160 = vmax.xlane.f32.xlu1 %v157_v18 }
  0x82   :  { %856 = vmatprep.subr.bf16.mxu1 %v1163_v0 }
  0x83   :  { %857 = vmatpush3.bf16.msra.mxu1 %v945_v25 }
  0x84   :  { %839 = vmatpush3.bf16.msra.mxu0 %v930_v14  ;;  %198 = vmax.xlane.f32.xlu0 %v196_v20  ;;  %v947_v20 = vld [vmem:[#allocation13 + $0x30] sm:$0xff]  }
  0x85   :  { %840 = vmatprep.subr.bf16.mxu0 %v1163_v0  ;;  %200 = vmax.xlane.f32.xlu1 %v197_v21  ;;  %v948_v21 = vld [vmem:[#allocation13 + $0x38] sm:$0xff]  }
  0x86   :  { %858 = vmatprep.subr.bf16.mxu1 %v1163_v0 }
  0x87   :  { %859 = vmatpush3.bf16.msra.mxu1 %v946_v26 }
  0x88   :  { %841 = vmatpush3.bf16.msra.mxu0 %v931_v15  ;;  %860 = vmatprep.subr.bf16.mxu1 %v1163_v0 }
  0x89   :  { %842 = vmatprep.subr.bf16.mxu0 %v1163_v0 }
  0x8b   :  { %861 = vmatpush3.bf16.msra.mxu1 %v947_v20 }
  0x8c   :  { %843 = vmatpush3.bf16.msra.mxu0 %v932_v16  ;;  %v940_v16 = vld [vmem:[#allocation15 + $0x38] sm:$0xff]   ;;  %862 = vmatprep.subr.bf16.mxu1 %v1163_v0 }
  0x8d   :  { %868 = vmatprep.subr.bf16.mxu0 %v1163_v0 }
  0x8f   :  { %863 = vmatpush3.bf16.msra.mxu1 %v948_v21 }
  0x90   :  { %888 = vmatprep.subr.bf16.mxu1 %v1163_v0 }
  0xfd   :  { %v129_v27 = vpop.xlane.xlu0 %128 }
  0xfe   :  { %v132_v28 = vmul.f32 0.03125, %v129_v27  ;;  %v137_v29 = vpop.xlane.xlu1 %136 }
  0xff   :  { %v140_v31 = vmul.f32 0.03125, %v137_v29  ;;  %v756_v29 = vld [vmem:[%s1433_s3] ss:$0 sm:$0xff] }
 0x100   :  { %v142_v30 = vmul.f32 %v132_v28, %v132_v28  ;;  %v148_v49 = vsub.f32 %v1320_v1, %v132_v28 }
 0x101   :  { %v131_v32 = vpop.xlane.xlu0 %130 }
 0x102   :  { %v144_v33 = vsub.f32 %v140_v31, %v142_v30  ;;  %v133_v34 = vmul.f32 0.03125, %v131_v32  ;;  %v139_v35 = vpop.xlane.xlu1 %138 }
 0x103   :  { %v141_v38 = vmul.f32 0.03125, %v139_v35 }
 0x104   :  { %v146_v36 = vmax.f32 %v144_v33, 0.0  ;;  %v143_v37 = vmul.f32 %v133_v34, %v133_v34  ;;  %v149_v50 = vsub.f32 %v1322_v2, %v133_v34 }
 0x105   :  { %v169_v43 = vpop.xlane.xlu0 %168 }
 0x106   :  { %v150_v39 = vadd.f32 1e-05, %v146_v36  ;;  %v145_v40 = vsub.f32 %v141_v38, %v143_v37  ;;  %v171_v44 = vpop.xlane.xlu1 %170  ;;  %v172_v45 = vmul.f32 0.015625, %v169_v43  ;;  %v949_v38 = vld [vmem:[#allocation16] sm:$0xff]  }
 0x107   :  { %v173_v47 = vmul.f32 0.015625, %v171_v44  ;;  %v953_v43 = vld [vmem:[#allocation16 + $0x20] sm:$0xff]   ;;  %v954_v44 = vld [vmem:[#allocation16 + $0x28] sm:$0xff]  }
 0x108   :  { %v147_v41 = vmax.f32 %v145_v40, 0.0  ;;  %957 = vrsqrt.f32 %v150_v39  ;;  %v182_v53 = vmul.f32 %v172_v45, %v172_v45  ;;  %v188_v13 = vsub.f32 %v1329_v6, %v172_v45  ;;  %v950_v40 = vld [vmem:[#allocation16 + $0x8] sm:$0xff]   ;;  %v773_v45 = vld [vmem:[%s1437_s7] ss:$0 sm:$0xff] }
 0x109   :  { %v177_v48 = vpop.xlane.xlu0 %176  ;;  %v183_v57 = vmul.f32 %v173_v47, %v173_v47  ;;  %v189_v14 = vsub.f32 %v1333_v7, %v173_v47 }
 0x10a   :  { %v151_v42 = vadd.f32 1e-05, %v147_v41  ;;  %v179_v51 = vpop.xlane.xlu1 %178  ;;  %v180_v54 = vmul.f32 0.015625, %v177_v48  ;;  %v951_v41 = vld [vmem:[#allocation16 + $0x10] sm:$0xff]  }
 0x10b   :  { %v181_v58 = vmul.f32 0.015625, %v179_v51  ;;  %v956_v51 = vld [vmem:[#allocation16 + $0x38] sm:$0xff]  }
 0x10c   :  { %959 = vrsqrt.f32 %v151_v42  ;;  %v184_v61 = vsub.f32 %v180_v54, %v182_v53  ;;  %v952_v42 = vld [vmem:[#allocation16 + $0x18] sm:$0xff]  }
 0x10d   :  { %v185_v62 = vsub.f32 %v181_v58, %v183_v57  ;;  %v159_v6 = vpop.xlane.xlu0 %158  ;;  %v790_v57 = vld [vmem:[%s1435_s5] ss:$0 sm:$0xff] }
 0x10e   :  { %v186_v1 = vmax.f32 %v184_v61, 0.0  ;;  %v161_v7 = vpop.xlane.xlu1 %160  ;;  %vm162_vm1 = vcmp.gt.f32.partialorder %v159_v6, 0.0 }
 0x10f   :  { %v187_v2 = vmax.f32 %v185_v62, 0.0  ;;  %vm163_vm2 = vcmp.gt.f32.partialorder %v161_v7, 0.0 }
 0x110   :  { %v190_v4 = vadd.f32 1e-05, %v186_v1 }
 0x111   :  { %v191_v5 = vadd.f32 1e-05, %v187_v2  ;;  %v199_v23 = vpop.xlane.xlu0 %198 }
 0x112   :  { %v958_v46 = vpop.eup %957  ;;  %961 = vrsqrt.f32 %v190_v4  ;;  %v201_v24 = vpop.xlane.xlu1 %200  ;;  %vm202_vm4 = vcmp.gt.f32.partialorder %v199_v23, 0.0 }
 0x113   :  { %v154_v55 = vmul.f32 %v958_v46, %v148_v49  ;;  %963 = vrsqrt.f32 %v191_v5  ;;  %vm203_vm5 = vcmp.gt.f32.partialorder %v201_v24, 0.0  ;;  %vm206_vm6 = vmand %vm162_vm1, %vm202_vm4  ;;  %v955_v46 = vld [vmem:[#allocation16 + $0x30] sm:$0xff]  }
 0x114   :  { %v754_v25 = vsel %vm206_vm6, 1.0, %v1163_v0  ;;  %vm207_vm7 = vmand %vm163_vm2, %vm203_vm5 }
 0x115   :  { %213 = vst.msk [vmem:[#allocation4] sm:$0xff] %vm212_vm3, %v754_v25  ;;  %v755_v26 = vsel %vm207_vm7, 1.0, %v1163_v0 }
 0x116   :  { %v960_v52 = vpop.eup %959  ;;  %214 = vst.msk [vmem:[#allocation4 + $0x8] sm:$0xff] %vm212_vm3, %v755_v26 }
 0x117   :  { %v155_v56 = vmul.f32 %v960_v52, %v149_v50 }
 0x119   :  { %v164_v60 = vpack.c.bf16 %v155_v56, %v154_v55 }
 0x11b   :  { %845 = vmatmul.mubr.bf16.vlgmr.msra.gmra.mrb[0].mxu0 %v164_v60 }
 0x11c   :  { %869 = vmatpush3.bf16.msra.mxu0 %v933_v59  ;;  %884 = vmatprep.mubr.msk.bf16.mxu0 %vm1164_vm0, %v1163_v0  ;;  %v962_v12 = vpop.eup %961  ;;  %v676_v27 = vld [vmem:[#allocation4] sm:$0xff] }
 0x11d   :  { %870 = vmatprep.subr.bf16.mxu0 %v1163_v0  ;;  %v964_v15 = vpop.eup %963  ;;  %v194_v17 = vmul.f32 %v962_v12, %v188_v13  ;;  %691 = vperm.xlu0 %923, %v676_v27   ;;  %v677_v28 = vld [vmem:[#allocation4 + $0x8] sm:$0xff] }
 0x11e   :  { %v195_v18 = vmul.f32 %v964_v15, %v189_v14  ;;  %696 = vperm.xlu1 %924, %v677_v28  }
 0x120   :  { %871 = vmatpush3.bf16.msra.mxu0 %v934_v63  ;;  %v204_v19 = vpack.c.bf16 %v195_v18, %v194_v17 }
 0x121   :  { %872 = vmatprep.subr.bf16.mxu0 %v1163_v0 }
 0x124   :  { %873 = vmatpush3.bf16.msra.mxu0 %v935_v3 }
 0x125   :  { %874 = vmatprep.subr.bf16.mxu0 %v1163_v0 }
 0x128   :  { %875 = vmatpush3.bf16.msra.mxu0 %v936_v8 }
 0x129   :  { %876 = vmatprep.subr.bf16.mxu0 %v1163_v0 }
 0x12c   :  { %877 = vmatpush3.bf16.msra.mxu0 %v937_v9 }
 0x12d   :  { %878 = vmatprep.subr.bf16.mxu0 %v1163_v0 }
 0x130   :  { %879 = vmatpush3.bf16.msra.mxu0 %v938_v10 }
 0x131   :  { %880 = vmatprep.subr.bf16.mxu0 %v1163_v0 }
 0x134   :  { %881 = vmatpush3.bf16.msra.mxu0 %v939_v11 }
 0x135   :  { %882 = vmatprep.subr.bf16.mxu0 %v1163_v0 }
 0x138   :  { %883 = vmatpush3.bf16.msra.mxu0 %v940_v16 }
 0x13b   :  { %885 = vmatmul.mubr.bf16.vlgmr.msra.gmra.mrb[4].mxu0 %v204_v19 }
 0x19c   :  { %v692_v59 = vpop.permute.xlu0 %691 }
 0x19d   :  { %v697_v63 = vpop.permute.xlu1 %696 }
 0x1ee   :  { %v325_v30 = vpop.f32.mrb[0].mxu0 }
 0x1ef   :  { %v326_v31 = vadd.f32 %v756_v29, %v325_v30  ;;  %v846_v32 = vpop.f32.mrb[1].mxu0 }
 0x1f0   :  { %v328_v33 = vpop.f32.mrb[2].mxu0 }
 0x1f1   :  { %v329_v34 = vadd.f32 %v756_v29, %v328_v33  ;;  %v847_v35 = vpop.f32.mrb[3].mxu0  ;;  %v332_v36 = vmax.f32 %v326_v31, 0.0 }
 0x1f3   :  { %v333_v37 = vmax.f32 %v329_v34, 0.0 }
 0x1f5   :  { %v336_v39 = vpack.c.bf16 %v333_v37, %v332_v36 }
 0x1f7   :  { %865 = vmatmul.mubr.bf16.vlgmr.msra.gmra.mrb[0].mxu1 %v336_v39 }
 0x1f8   :  { %889 = vmatpush3.bf16.msra.mxu1 %v949_v38  ;;  %904 = vmatprep.mubr.msk.bf16.mxu1 %vm1164_vm0, %v1163_v0 }
 0x1f9   :  { %890 = vmatprep.subr.bf16.mxu1 %v1163_v0 }
 0x1fc   :  { %891 = vmatpush3.bf16.msra.mxu1 %v950_v40 }
 0x1fd   :  { %892 = vmatprep.subr.bf16.mxu1 %v1163_v0 }
 0x200   :  { %893 = vmatpush3.bf16.msra.mxu1 %v951_v41 }
 0x201   :  { %894 = vmatprep.subr.bf16.mxu1 %v1163_v0 }
 0x204   :  { %895 = vmatpush3.bf16.msra.mxu1 %v952_v42 }
 0x205   :  { %896 = vmatprep.subr.bf16.mxu1 %v1163_v0 }
 0x208   :  { %897 = vmatpush3.bf16.msra.mxu1 %v953_v43 }
 0x209   :  { %898 = vmatprep.subr.bf16.mxu1 %v1163_v0 }
 0x20c   :  { %899 = vmatpush3.bf16.msra.mxu1 %v954_v44 }
 0x20d   :  { %900 = vmatprep.subr.bf16.mxu1 %v1163_v0 }
 0x20e   :  { %v552_v47 = vpop.f32.mrb[4].mxu0 }
 0x20f   :  { %v553_v48 = vadd.f32 %v773_v45, %v552_v47  ;;  %v886_v49 = vpop.f32.mrb[5].mxu0 }
 0x210   :  { %v555_v50 = vpop.f32.mrb[6].mxu0  ;;  %901 = vmatpush3.bf16.msra.mxu1 %v955_v46 }
 0x211   :  { %v556_v52 = vadd.f32 %v773_v45, %v555_v50  ;;  %v887_v53 = vpop.f32.mrb[7].mxu0  ;;  %902 = vmatprep.subr.bf16.mxu1 %v1163_v0  ;;  %v559_v54 = vmax.f32 %v553_v48, 0.0 }
 0x213   :  { %v560_v55 = vmax.f32 %v556_v52, 0.0 }
 0x214   :  { %903 = vmatpush3.bf16.msra.mxu1 %v956_v51 }
 0x215   :  { %v563_v56 = vpack.c.bf16 %v560_v55, %v559_v54 }
 0x217   :  { %905 = vmatmul.mubr.bf16.vlgmr.msra.gmra.mrb[4].mxu1 %v563_v56 }
 0x2ca   :  { %v435_v58 = vpop.f32.mrb[0].mxu1 }
 0x2cb   :  { %v687_v60 = vadd.f32 %v790_v57, %v435_v58  ;;  %v866_v61 = vpop.f32.mrb[1].mxu1 }
 0x2cc   :  { %v438_v62 = vpop.f32.mrb[2].mxu1 }
 0x2cd   :  { %v699_v1 = vmul.f32 %v692_v59, %v687_v60  ;;  %v688_v2 = vadd.f32 %v790_v57, %v438_v62  ;;  %v867_v0 = vpop.f32.mrb[3].mxu1 }
 0x2cf   :  { %701 = vst [vmem:[#allocation18] sm:$0xff] %v699_v1  ;;  %v700_v3 = vmul.f32 %v697_v63, %v688_v2 }
 0x2d1   :  { %702 = vst [vmem:[#allocation18 + $0x8] sm:$0xff] %v700_v3 }
 0x2d2   :  { %1108 = shalt.err (!%p1105_p10)
}
 0x2d3   :  { %s1109_s26 = scalar_lea.hbm %s1440_s10, 256 }
 0x2d4   :  { %p1110_p11 = scmp.ne.s32.totalorder %s1440_s10, %s1109_s26  ;;  %p1113_p12 = scmp.lt.u32.totalorder %s1109_s26, %s1440_s10 }
 0x2d6   :  { %p1115_p13 = pnand %p1113_p12, %p1110_p11 }
 0x2d8   :  { %1118 = shalt.err (!%p1115_p13)
}
 0x2d9   :  { %729 = dma.vmem_to_hbm [thread:$0]  %s724_s21, 256, %s1440_s10, [#allocation9], %s1154_s27, %s1154_s27, %s1155_s28  }
 0x2da   :  { %v791_v4 = vld [vmem:[%s1439_s9] ss:$0 sm:$0xff]  ;;  %s1167_s15 = smov [#allocation19]  }
 0x2db   :  { %s735_s17 = sshll.u32 %s1167_s15, 4  ;;  %s736_s17 = int_to_ptr.vmem [resolvable:$true] %s735_s17 }
 0x2dc   :  { %s1119_s19 = scalar_lea.vmem %s736_s17, 256  ;;  %p1124_p1 = scmp.lt.s32.totalorder %s736_s17, %s736_s17 }
 0x2dd   :  { %p1120_p0 = scmp.ne.s32.totalorder %s736_s17, %s1119_s19  ;;  %p1125_p2 = scmp.lt.s32.totalorder %s1119_s19, %s1119_s19 }
 0x2df   :  { %p1126_p3 = por %p1125_p2, %p1124_p1 }
 0x2e1   :  { %p1127_p4 = pnand %p1126_p3, %p1120_p0 }
 0x2ea   :  { %v662_v5 = vpop.f32.mrb[4].mxu1 }
 0x2eb   :  { %v712_v8 = vadd.f32 %v791_v4, %v662_v5  ;;  %v906_v9 = vpop.f32.mrb[5].mxu1 }
 0x2ec   :  { %v665_v10 = vpop.f32.mrb[6].mxu1 }
 0x2ed   :  { %v714_v11 = vmul.f32 %v712_v8, %v692_v59  ;;  %v713_v12 = vadd.f32 %v791_v4, %v665_v10  ;;  %v907_v13 = vpop.f32.mrb[7].mxu1 }
 0x2ef   :  { %716 = vst [vmem:[#allocation19] sm:$0xff] %v714_v11  ;;  %v715_v14 = vmul.f32 %v713_v12, %v697_v63 }
 0x2f1   :  { %717 = vst [vmem:[#allocation19 + $0x8] sm:$0xff] %v715_v14 }
 0x2f2   :  { %1130 = shalt.err (!%p1127_p4)
}
 0x2f3   :  { %s1131_s20 = scalar_lea.hbm %s1441_s11, 256 }
 0x2f4   :  { %p1132_p5 = scmp.ne.s32.totalorder %s1441_s11, %s1131_s20  ;;  %p1135_p6 = scmp.lt.u32.totalorder %s1131_s20, %s1441_s11 }
 0x2f6   :  { %p1137_p7 = pnand %p1135_p6, %p1132_p5 }
 0x2f8   :  { %1140 = shalt.err (!%p1137_p7)
}
 0x2f9   :  { %741 = dma.vmem_to_hbm [thread:$0]  %s736_s17, 256, %s1441_s11, [#allocation20], %s1154_s27, %s1154_s27, %s1155_s28  }
 0x2fa   :  { %1149 = dma.done.wait [#allocation9], 256  }
 0x2fb   :  { %1150 = vsyncadd [#allocation9], 4294967040 }
 0x2fc   :  { %1151 = dma.done.wait [#allocation20], 256  }
 0x2fd   :  { %1152 = vsyncadd [#allocation20], 4294967040 }
 0x2fe   :  { %748 = vsyncpa [#allocation8], 1 }
 0x2ff   :  { %749 = vsyncpa [#allocation11], 1 }
 0x300   :  { %750 = vsyncpa [#allocation14], 1 }
 0x301   :  { %751 = vsyncpa [#allocation17], 1 }
 0x302   :  { %752 = vsyncpa [#allocation9], 1 }
 0x303   :  { %753 = vsyncpa [#allocation20], 1 }

// kernel: tpu_custom_call.1
= control target key start
LH: loop header
LB: loop body
LE: loop exit
PB: predicated region body
PF: predicated region fallthrough
CT: control target
= control target key end

     0   :  { %17 = vsyncpa [#allocation8], 0  ;;  %s1430_s0 = inlined_call_operand.hbm [shape: f32[16,128], index: 0, kind: input, shape index: {}]   ;;  %s1431_s1 = inlined_call_operand.hbm [shape: f32[16,128], index: 1, kind: input, shape index: {}]   ;;  %s1432_s2 = inlined_call_operand.hbm [shape: bf16[128,128], index: 2, kind: input, shape index: {}]   ;;  %s1433_s3 = inlined_call_operand.vmem [shape: f32[1,128], index: 3, kind: input, shape index: {}]   ;;  %s1434_s4 = inlined_call_operand.hbm [shape: bf16[128,128], index: 4, kind: input, shape index: {}]   ;;  %s1435_s5 = inlined_call_operand.vmem [shape: f32[1,128], index: 5, kind: input, shape index: {}]   ;;  %s1436_s6 = inlined_call_operand.hbm [shape: bf16[128,128], index: 6, kind: input, shape index: {}]   ;;  %s1437_s7 = inlined_call_operand.vmem [shape: f32[1,128], index: 7, kind: input, shape index: {}]   ;;  %s1438_s8 = inlined_call_operand.hbm [shape: bf16[128,128], index: 8, kind: input, shape index: {}]   ;;  %s1439_s9 = inlined_call_operand.vmem [shape: f32[1,128], index: 9, kind: input, shape index: {}]   ;;  %s1440_s10 = inlined_call_operand.hbm [shape: f32[16,128], index: 10, kind: output, shape index: {0}]   ;;  %s1441_s11 = inlined_call_operand.hbm [shape: f32[16,128], index: 11, kind: output, shape index: {1}]  }
   0x1   :  { %18 = vsyncpa [#allocation11], 0 }
   0x2   :  { %19 = vsyncpa [#allocation14], 0 }
   0x3   :  { %20 = vsyncpa [#allocation17], 0 }
   0x4   :  { %21 = vsyncpa [#allocation9], 0 }
   0x5   :  { %22 = vsyncpa [#allocation20], 0  ;;  %s1153_s17 = smov [#allocation10]   ;;  %s965_s21 = scalar_lea.hbm %s1431_s1, 256 }
   0x6   :  { %s40_s18 = sshll.u32 %s1153_s17, 4  ;;  %p966_p0 = scmp.ne.s32.totalorder %s1431_s1, %s965_s21  ;;  %s41_s18 = int_to_ptr.vmem [resolvable:$true] %s40_s18 }
   0x7   :  { %p969_p1 = scmp.lt.u32.totalorder %s965_s21, %s1431_s1 }
   0x9   :  { %p971_p2 = pnand %p969_p1, %p966_p0 }
   0xb   :  { %974 = shalt.err (!%p971_p2)
}
   0xc   :  { %s975_s26 = scalar_lea.vmem %s41_s18, 256  ;;  %p980_p4 = scmp.lt.s32.totalorder %s41_s18, %s41_s18 }
   0xd   :  { %p976_p3 = scmp.ne.s32.totalorder %s41_s18, %s975_s26  ;;  %p981_p5 = scmp.lt.s32.totalorder %s975_s26, %s975_s26 }
   0xf   :  { %p982_p6 = por %p981_p5, %p980_p4 }
  0x11   :  { %p983_p7 = pnand %p982_p6, %p976_p3 }
  0x13   :  { %986 = shalt.err (!%p983_p7)
}
  0x14   :  { %s1154_s27 = smov 128   ;;  %s1155_s28 = smov 8  }
  0x15   :  { %46 = dma.hbm_to_vmem [thread:$0]  %s1431_s1, 256, %s41_s18, [#allocation11], %s1154_s27, %s1154_s27, %s1155_s28  }
  0x16   :  { %s1156_s12 = smov [#allocation13]   ;;  %s1157_s14 = smov [#allocation7]  }
  0x17   :  { %s66_s13 = sshll.u32 %s1156_s12, 4  ;;  %s28_s15 = sshll.u32 %s1157_s14, 4  ;;  %s67_s13 = int_to_ptr.vmem [resolvable:$true] %s66_s13  ;;  %s29_s15 = int_to_ptr.vmem [resolvable:$true] %s28_s15 }
  0x18   :  { %s987_s19 = scalar_lea.hbm %s1434_s4, 1024 }
  0x19   :  { %p988_p8 = scmp.ne.s32.totalorder %s1434_s4, %s987_s19  ;;  %p991_p9 = scmp.lt.u32.totalorder %s987_s19, %s1434_s4 }
  0x1b   :  { %p993_p10 = pnand %p991_p9, %p988_p8 }
  0x1d   :  { %996 = shalt.err (!%p993_p10)
}
  0x1e   :  { %s997_s1 = scalar_lea.vmem %s67_s13, 1024  ;;  %p1002_p12 = scmp.lt.s32.totalorder %s67_s13, %s67_s13 }
  0x1f   :  { %p998_p11 = scmp.ne.s32.totalorder %s67_s13, %s997_s1  ;;  %p1003_p13 = scmp.lt.s32.totalorder %s997_s1, %s997_s1 }
  0x21   :  { %p1004_p0 = por %p1003_p13, %p1002_p12 }
  0x23   :  { %p1005_p1 = pnand %p1004_p0, %p998_p11 }
  0x25   :  { %1008 = shalt.err (!%p1005_p1)
}
  0x26   :  { %s1158_s18 = smov 64   ;;  %s1159_s24 = smov 4  }
  0x27   :  { %72 = dma.hbm_to_vmem [thread:$0]  %s1434_s4, 1024, %s67_s13, [#allocation14], %s1158_s18, %s1158_s18, %s1159_s24  }
  0x28   :  { %s1009_s12 = scalar_lea.hbm %s1430_s0, 256 }
  0x29   :  { %p1010_p2 = scmp.ne.s32.totalorder %s1430_s0, %s1009_s12  ;;  %p1013_p3 = scmp.lt.u32.totalorder %s1009_s12, %s1430_s0 }
  0x2b   :  { %p1015_p4 = pnand %p1013_p3, %p1010_p2 }
  0x2d   :  { %1018 = shalt.err (!%p1015_p4)
}
  0x2e   :  { %s1019_s20 = scalar_lea.vmem %s29_s15, 256  ;;  %p1024_p6 = scmp.lt.s32.totalorder %s29_s15, %s29_s15 }
  0x2f   :  { %p1020_p5 = scmp.ne.s32.totalorder %s29_s15, %s1019_s20  ;;  %p1025_p7 = scmp.lt.s32.totalorder %s1019_s20, %s1019_s20 }
  0x31   :  { %p1026_p8 = por %p1025_p7, %p1024_p6 }
  0x33   :  { %p1027_p9 = pnand %p1026_p8, %p1020_p5 }
  0x35   :  { %1030 = shalt.err (!%p1027_p9)
}
  0x36   :  { %34 = dma.hbm_to_vmem [thread:$0]  %s1430_s0, 256, %s29_s15, [#allocation8], %s1154_s27, %s1154_s27, %s1155_s28  }
  0x37   :  { %s1160_s21 = smov [#allocation12]   ;;  %s1161_s23 = smov [#allocation15]  }
  0x38   :  { %s52_s22 = sshll.u32 %s1160_s21, 4  ;;  %s80_s1 = sshll.u32 %s1161_s23, 4  ;;  %s53_s22 = int_to_ptr.vmem [resolvable:$true] %s52_s22  ;;  %s81_s1 = int_to_ptr.vmem [resolvable:$true] %s80_s1 }
  0x39   :  { %s1031_s29 = scalar_lea.hbm %s1432_s2, 1024 }
  0x3a   :  { %p1032_p10 = scmp.ne.s32.totalorder %s1432_s2, %s1031_s29  ;;  %p1035_p11 = scmp.lt.u32.totalorder %s1031_s29, %s1432_s2 }
  0x3c   :  { %p1037_p12 = pnand %p1035_p11, %p1032_p10 }
  0x3e   :  { %1040 = shalt.err (!%p1037_p12)
}
  0x3f   :  { %s1041_s0 = scalar_lea.vmem %s53_s22, 1024  ;;  %p1046_p0 = scmp.lt.s32.totalorder %s53_s22, %s53_s22 }
  0x40   :  { %p1042_p13 = scmp.ne.s32.totalorder %s53_s22, %s1041_s0  ;;  %p1047_p1 = scmp.lt.s32.totalorder %s1041_s0, %s1041_s0 }
  0x42   :  { %p1048_p2 = por %p1047_p1, %p1046_p0 }
  0x44   :  { %p1049_p3 = pnand %p1048_p2, %p1042_p13 }
  0x46   :  { %1052 = shalt.err (!%p1049_p3)
}
  0x47   :  { %58 = dma.hbm_to_vmem [thread:$0]  %s1432_s2, 1024, %s53_s22, [#allocation11], %s1158_s18, %s1158_s18, %s1159_s24  }
  0x48   :  { %s1053_s4 = scalar_lea.hbm %s1436_s6, 1024 }
  0x49   :  { %p1054_p4 = scmp.ne.s32.totalorder %s1436_s6, %s1053_s4  ;;  %p1057_p5 = scmp.lt.u32.totalorder %s1053_s4, %s1436_s6 }
  0x4b   :  { %p1059_p6 = pnand %p1057_p5, %p1054_p4 }
  0x4d   :  { %1062 = shalt.err (!%p1059_p6)
}
  0x4e   :  { %s1063_s26 = scalar_lea.vmem %s81_s1, 1024  ;;  %p1068_p8 = scmp.lt.s32.totalorder %s81_s1, %s81_s1 }
  0x4f   :  { %p1064_p7 = scmp.ne.s32.totalorder %s81_s1, %s1063_s26  ;;  %p1069_p9 = scmp.lt.s32.totalorder %s1063_s26, %s1063_s26 }
  0x51   :  { %p1070_p10 = por %p1069_p9, %p1068_p8 }
  0x53   :  { %p1071_p11 = pnand %p1070_p10, %p1064_p7 }
  0x55   :  { %1074 = shalt.err (!%p1071_p11)
}
  0x56   :  { %86 = dma.hbm_to_vmem [thread:$0]  %s1436_s6, 1024, %s81_s1, [#allocation14], %s1158_s18, %s1158_s18, %s1159_s24  }
  0x57   :  { %s1162_s29 = smov [#allocation16]   ;;  %s1075_s16 = scalar_lea.hbm %s1438_s8, 1024 }
  0x58   :  { %s94_s30 = sshll.u32 %s1162_s29, 4  ;;  %p1076_p12 = scmp.ne.s32.totalorder %s1438_s8, %s1075_s16  ;;  %s95_s30 = int_to_ptr.vmem [resolvable:$true] %s94_s30 }
  0x59   :  { %p1079_p13 = scmp.lt.u32.totalorder %s1075_s16, %s1438_s8 }
  0x5b   :  { %p1081_p0 = pnand %p1079_p13, %p1076_p12 }
  0x5d   :  { %1084 = shalt.err (!%p1081_p0)
}
  0x5e   :  { %s1085_s20 = scalar_lea.vmem %s95_s30, 1024  ;;  %p1090_p2 = scmp.lt.s32.totalorder %s95_s30, %s95_s30 }
  0x5f   :  { %p1086_p1 = scmp.ne.s32.totalorder %s95_s30, %s1085_s20  ;;  %p1091_p3 = scmp.lt.s32.totalorder %s1085_s20, %s1085_s20 }
  0x61   :  { %p1092_p4 = por %p1091_p3, %p1090_p2 }
  0x63   :  { %p1093_p5 = pnand %p1092_p4, %p1086_p1 }
  0x65   :  { %1096 = shalt.err (!%p1093_p5)
}
  0x66   :  { %100 = dma.hbm_to_vmem [thread:$0]  %s1438_s8, 1024, %s95_s30, [#allocation17], %s1158_s18, %s1158_s18, %s1159_s24  }
  0x67   :  { %1141 = dma.done.wait [#allocation8], 256  }
  0x68   :  { %1142 = vsyncadd [#allocation8], 4294967040 }
  0x69   :  { %1143 = dma.done.wait [#allocation11], 1280  }
  0x6a   :  { %1144 = vsyncadd [#allocation11], 4294966016 }
  0x6b   :  { %1145 = dma.done.wait [#allocation14], 2048  }
  0x6c   :  { %1146 = vsyncadd [#allocation14], 4294965248 }
  0x6d   :  { %1147 = dma.done.wait [#allocation17], 1024  }
  0x6e   :  { %1148 = vsyncadd [#allocation17], 4294966272  ;;  %v1163_v0 = vmov 0.0   ;;  %v1320_v1 = vld [vmem:[#allocation7] sm:$0xff]  ;;  %v1322_v2 = vld [vmem:[#allocation7 + $0x8] sm:$0xff]  ;;  %vm1164_vm0 = vmmov 0  }
  0x6f   :  { %828 = vmatprep.subr.bf16.mxu0 %v1163_v0  ;;  %848 = vmatprep.subr.bf16.mxu1 %v1163_v0  ;;  %v134_v3 = vmul.f32 %v1320_v1, %v1320_v1  ;;  %v925_v4 = vld [vmem:[#allocation12] sm:$0xff]   ;;  %v135_v5 = vmul.f32 %v1322_v2, %v1322_v2  ;;  %v1329_v6 = vld [vmem:[#allocation10] sm:$0xff]  ;;  %v1333_v7 = vld [vmem:[#allocation10 + $0x8] sm:$0xff]  ;;  %v156_v17 = vand.u32 2147483647, %v1320_v1  ;;  %vm212_vm3 = vcmask 7168  }
  0x70   :  { %128 = vadd.xlane.f32.xlu0 %v1320_v1  ;;  %829 = vmatpush3.bf16.msra.mxu0 %v925_v4  ;;  %v174_v8 = vmul.f32 %v1329_v6, %v1329_v6  ;;  %v175_v9 = vmul.f32 %v1333_v7, %v1333_v7  ;;  %v926_v10 = vld [vmem:[#allocation12 + $0x8] sm:$0xff]   ;;  %v927_v11 = vld [vmem:[#allocation12 + $0x10] sm:$0xff]   ;;  %v928_v12 = vld [vmem:[#allocation12 + $0x18] sm:$0xff]   ;;  %v157_v18 = vand.u32 2147483647, %v1322_v2  ;;  %s1166_s13 = smov [#allocation18]  }
  0x71   :  { %136 = vadd.xlane.f32.xlu1 %v134_v3  ;;  %830 = vmatprep.subr.bf16.mxu0 %v1163_v0  ;;  %v929_v13 = vld [vmem:[#allocation12 + $0x20] sm:$0xff]   ;;  %v930_v14 = vld [vmem:[#allocation12 + $0x28] sm:$0xff]   ;;  %v931_v15 = vld [vmem:[#allocation12 + $0x30] sm:$0xff]   ;;  %v196_v20 = vand.u32 2147483647, %v1329_v6  ;;  %s723_s21 = sshll.u32 %s1166_s13, 4  ;;  %s724_s21 = int_to_ptr.vmem [resolvable:$true] %s723_s21 }
  0x72   :  { %v932_v16 = vld [vmem:[#allocation12 + $0x38] sm:$0xff]   ;;  %844 = vmatprep.mubr.msk.bf16.mxu0 %vm1164_vm0, %v1163_v0  ;;  %864 = vmatprep.mubr.msk.bf16.mxu1 %vm1164_vm0, %v1163_v0  ;;  %v941_v19 = vld [vmem:[#allocation13] sm:$0xff]   ;;  %v197_v21 = vand.u32 2147483647, %v1333_v7  ;;  %v942_v22 = vld [vmem:[#allocation13 + $0x8] sm:$0xff]   ;;  %s1097_s23 = scalar_lea.vmem %s724_s21, 256  ;;  %p1102_p7 = scmp.lt.s32.totalorder %s724_s21, %s724_s21 }
  0x73   :  { %849 = vmatpush3.bf16.msra.mxu1 %v941_v19  ;;  %v943_v23 = vld [vmem:[#allocation13 + $0x10] sm:$0xff]   ;;  %v944_v24 = vld [vmem:[#allocation13 + $0x18] sm:$0xff]   ;;  %v945_v25 = vld [vmem:[#allocation13 + $0x20] sm:$0xff]   ;;  %p1098_p6 = scmp.ne.s32.totalorder %s724_s21, %s1097_s23  ;;  %p1103_p8 = scmp.lt.s32.totalorder %s1097_s23, %s1097_s23 }
  0x74   :  { %130 = vadd.xlane.f32.xlu0 %v1322_v2  ;;  %831 = vmatpush3.bf16.msra.mxu0 %v926_v10  ;;  %v946_v26 = vld [vmem:[#allocation13 + $0x28] sm:$0xff]   ;;  %v933_v59 = vld [vmem:[#allocation15] sm:$0xff]   ;;  %v935_v3 = vld [vmem:[#allocation15 + $0x10] sm:$0xff]  }
  0x75   :  { %138 = vadd.xlane.f32.xlu1 %v135_v5  ;;  %832 = vmatprep.subr.bf16.mxu0 %v1163_v0  ;;  %v934_v63 = vld [vmem:[#allocation15 + $0x8] sm:$0xff]   ;;  %p1104_p9 = por %p1103_p8, %p1102_p7 }
  0x76   :  { %850 = vmatprep.subr.bf16.mxu1 %v1163_v0  ;;  %v938_v10 = vld [vmem:[#allocation15 + $0x28] sm:$0xff]  }
  0x77   :  { %851 = vmatpush3.bf16.msra.mxu1 %v942_v22  ;;  %v1165_v22 = vmov 0   ;;  %p1105_p10 = pnand %p1104_p9, %p1098_p6 }
  0x78   :  { %168 = vadd.xlane.f32.xlu0 %v1329_v6  ;;  %833 = vmatpush3.bf16.msra.mxu0 %v927_v11  ;;  %v939_v11 = vld [vmem:[#allocation15 + $0x30] sm:$0xff]  }
  0x79   :  { %170 = vadd.xlane.f32.xlu1 %v1333_v7  ;;  %834 = vmatprep.subr.bf16.mxu0 %v1163_v0 }
  0x7a   :  { %852 = vmatprep.subr.bf16.mxu1 %v1163_v0  ;;  %923 = vset.pattern.permute.xlu0 %v1165_v22 }
  0x7b   :  { %853 = vmatpush3.bf16.msra.mxu1 %v943_v23  ;;  %924 = vset.pattern.permute.xlu1 %v1165_v22 }
  0x7c   :  { %176 = vadd.xlane.f32.xlu0 %v174_v8  ;;  %835 = vmatpush3.bf16.msra.mxu0 %v928_v12  ;;  %v936_v8 = vld [vmem:[#allocation15 + $0x18] sm:$0xff]  }
  0x7d   :  { %178 = vadd.xlane.f32.xlu1 %v175_v9  ;;  %836 = vmatprep.subr.bf16.mxu0 %v1163_v0  ;;  %v937_v9 = vld [vmem:[#allocation15 + $0x20] sm:$0xff]  }
  0x7e   :  { %854 = vmatprep.subr.bf16.mxu1 %v1163_v0 }
  0x7f   :  { %855 = vmatpush3.bf16.msra.mxu1 %v944_v24 }
  0x80   :  { %837 = vmatpush3.bf16.msra.mxu0 %v929_v13  ;;  %158 = vmax.xlane.f32.xlu0 %v156_v17 }
  0x81   :  { %838 = vmatprep.subr.bf16.mxu0 %v1163_v0  ;;  %160 = vmax.xlane.f32.xlu1 %v157_v18 }
  0x82   :  { %856 = vmatprep.subr.bf16.mxu1 %v1163_v0 }
  0x83   :  { %857 = vmatpush3.bf16.msra.mxu1 %v945_v25 }
  0x84   :  { %839 = vmatpush3.bf16.msra.mxu0 %v930_v14  ;;  %198 = vmax.xlane.f32.xlu0 %v196_v20  ;;  %v947_v20 = vld [vmem:[#allocation13 + $0x30] sm:$0xff]  }
  0x85   :  { %840 = vmatprep.subr.bf16.mxu0 %v1163_v0  ;;  %200 = vmax.xlane.f32.xlu1 %v197_v21  ;;  %v948_v21 = vld [vmem:[#allocation13 + $0x38] sm:$0xff]  }
  0x86   :  { %858 = vmatprep.subr.bf16.mxu1 %v1163_v0 }
  0x87   :  { %859 = vmatpush3.bf16.msra.mxu1 %v946_v26 }
  0x88   :  { %841 = vmatpush3.bf16.msra.mxu0 %v931_v15  ;;  %860 = vmatprep.subr.bf16.mxu1 %v1163_v0 }
  0x89   :  { %842 = vmatprep.subr.bf16.mxu0 %v1163_v0 }
  0x8b   :  { %861 = vmatpush3.bf16.msra.mxu1 %v947_v20 }
  0x8c   :  { %843 = vmatpush3.bf16.msra.mxu0 %v932_v16  ;;  %v940_v16 = vld [vmem:[#allocation15 + $0x38] sm:$0xff]   ;;  %862 = vmatprep.subr.bf16.mxu1 %v1163_v0 }
  0x8d   :  { %868 = vmatprep.subr.bf16.mxu0 %v1163_v0 }
  0x8f   :  { %863 = vmatpush3.bf16.msra.mxu1 %v948_v21 }
  0x90   :  { %888 = vmatprep.subr.bf16.mxu1 %v1163_v0 }
  0xfd   :  { %v129_v27 = vpop.xlane.xlu0 %128 }
  0xfe   :  { %v132_v28 = vmul.f32 0.03125, %v129_v27  ;;  %v137_v29 = vpop.xlane.xlu1 %136 }
  0xff   :  { %v140_v31 = vmul.f32 0.03125, %v137_v29  ;;  %v756_v29 = vld [vmem:[%s1433_s3] ss:$0 sm:$0xff] }
 0x100   :  { %v142_v30 = vmul.f32 %v132_v28, %v132_v28  ;;  %v148_v49 = vsub.f32 %v1320_v1, %v132_v28 }
 0x101   :  { %v131_v32 = vpop.xlane.xlu0 %130 }
 0x102   :  { %v144_v33 = vsub.f32 %v140_v31, %v142_v30  ;;  %v133_v34 = vmul.f32 0.03125, %v131_v32  ;;  %v139_v35 = vpop.xlane.xlu1 %138 }
 0x103   :  { %v141_v38 = vmul.f32 0.03125, %v139_v35 }
 0x104   :  { %v146_v36 = vmax.f32 %v144_v33, 0.0  ;;  %v143_v37 = vmul.f32 %v133_v34, %v133_v34  ;;  %v149_v50 = vsub.f32 %v1322_v2, %v133_v34 }
 0x105   :  { %v169_v43 = vpop.xlane.xlu0 %168 }
 0x106   :  { %v150_v39 = vadd.f32 1e-05, %v146_v36  ;;  %v145_v40 = vsub.f32 %v141_v38, %v143_v37  ;;  %v171_v44 = vpop.xlane.xlu1 %170  ;;  %v172_v45 = vmul.f32 0.015625, %v169_v43  ;;  %v949_v38 = vld [vmem:[#allocation16] sm:$0xff]  }
 0x107   :  { %v173_v47 = vmul.f32 0.015625, %v171_v44  ;;  %v953_v43 = vld [vmem:[#allocation16 + $0x20] sm:$0xff]   ;;  %v954_v44 = vld [vmem:[#allocation16 + $0x28] sm:$0xff]  }
 0x108   :  { %v147_v41 = vmax.f32 %v145_v40, 0.0  ;;  %957 = vrsqrt.f32 %v150_v39  ;;  %v182_v53 = vmul.f32 %v172_v45, %v172_v45  ;;  %v188_v13 = vsub.f32 %v1329_v6, %v172_v45  ;;  %v950_v40 = vld [vmem:[#allocation16 + $0x8] sm:$0xff]   ;;  %v773_v45 = vld [vmem:[%s1437_s7] ss:$0 sm:$0xff] }
 0x109   :  { %v177_v48 = vpop.xlane.xlu0 %176  ;;  %v183_v57 = vmul.f32 %v173_v47, %v173_v47  ;;  %v189_v14 = vsub.f32 %v1333_v7, %v173_v47 }
 0x10a   :  { %v151_v42 = vadd.f32 1e-05, %v147_v41  ;;  %v179_v51 = vpop.xlane.xlu1 %178  ;;  %v180_v54 = vmul.f32 0.015625, %v177_v48  ;;  %v951_v41 = vld [vmem:[#allocation16 + $0x10] sm:$0xff]  }
 0x10b   :  { %v181_v58 = vmul.f32 0.015625, %v179_v51  ;;  %v956_v51 = vld [vmem:[#allocation16 + $0x38] sm:$0xff]  }
 0x10c   :  { %959 = vrsqrt.f32 %v151_v42  ;;  %v184_v61 = vsub.f32 %v180_v54, %v182_v53  ;;  %v952_v42 = vld [vmem:[#allocation16 + $0x18] sm:$0xff]  }
 0x10d   :  { %v185_v62 = vsub.f32 %v181_v58, %v183_v57  ;;  %v159_v6 = vpop.xlane.xlu0 %158  ;;  %v790_v57 = vld [vmem:[%s1435_s5] ss:$0 sm:$0xff] }
 0x10e   :  { %v186_v1 = vmax.f32 %v184_v61, 0.0  ;;  %v161_v7 = vpop.xlane.xlu1 %160  ;;  %vm162_vm1 = vcmp.gt.f32.partialorder %v159_v6, 0.0 }
 0x10f   :  { %v187_v2 = vmax.f32 %v185_v62, 0.0  ;;  %vm163_vm2 = vcmp.gt.f32.partialorder %v161_v7, 0.0 }
 0x110   :  { %v190_v4 = vadd.f32 1e-05, %v186_v1 }
 0x111   :  { %v191_v5 = vadd.f32 1e-05, %v187_v2  ;;  %v199_v23 = vpop.xlane.xlu0 %198 }
 0x112   :  { %v958_v46 = vpop.eup %957  ;;  %961 = vrsqrt.f32 %v190_v4  ;;  %v201_v24 = vpop.xlane.xlu1 %200  ;;  %vm202_vm4 = vcmp.gt.f32.partialorder %v199_v23, 0.0 }
 0x113   :  { %v154_v55 = vmul.f32 %v958_v46, %v148_v49  ;;  %963 = vrsqrt.f32 %v191_v5  ;;  %vm203_vm5 = vcmp.gt.f32.partialorder %v201_v24, 0.0  ;;  %vm206_vm6 = vmand %vm162_vm1, %vm202_vm4  ;;  %v955_v46 = vld [vmem:[#allocation16 + $0x30] sm:$0xff]  }
 0x114   :  { %v754_v25 = vsel %vm206_vm6, 1.0, %v1163_v0  ;;  %vm207_vm7 = vmand %vm163_vm2, %vm203_vm5 }
 0x115   :  { %213 = vst.msk [vmem:[#allocation4] sm:$0xff] %vm212_vm3, %v754_v25  ;;  %v755_v26 = vsel %vm207_vm7, 1.0, %v1163_v0 }
 0x116   :  { %v960_v52 = vpop.eup %959  ;;  %214 = vst.msk [vmem:[#allocation4 + $0x8] sm:$0xff] %vm212_vm3, %v755_v26 }
 0x117   :  { %v155_v56 = vmul.f32 %v960_v52, %v149_v50 }
 0x119   :  { %v164_v60 = vpack.c.bf16 %v155_v56, %v154_v55 }
 0x11b   :  { %845 = vmatmul.mubr.bf16.vlgmr.msra.gmra.mrb[0].mxu0 %v164_v60 }
 0x11c   :  { %869 = vmatpush3.bf16.msra.mxu0 %v933_v59  ;;  %884 = vmatprep.mubr.msk.bf16.mxu0 %vm1164_vm0, %v1163_v0  ;;  %v962_v12 = vpop.eup %961  ;;  %v676_v27 = vld [vmem:[#allocation4] sm:$0xff] }
 0x11d   :  { %870 = vmatprep.subr.bf16.mxu0 %v1163_v0  ;;  %v964_v15 = vpop.eup %963  ;;  %v194_v17 = vmul.f32 %v962_v12, %v188_v13  ;;  %691 = vperm.xlu0 %923, %v676_v27   ;;  %v677_v28 = vld [vmem:[#allocation4 + $0x8] sm:$0xff] }
 0x11e   :  { %v195_v18 = vmul.f32 %v964_v15, %v189_v14  ;;  %696 = vperm.xlu1 %924, %v677_v28  }
 0x120   :  { %871 = vmatpush3.bf16.msra.mxu0 %v934_v63  ;;  %v204_v19 = vpack.c.bf16 %v195_v18, %v194_v17 }
 0x121   :  { %872 = vmatprep.subr.bf16.mxu0 %v1163_v0 }
 0x124   :  { %873 = vmatpush3.bf16.msra.mxu0 %v935_v3 }
 0x125   :  { %874 = vmatprep.subr.bf16.mxu0 %v1163_v0 }
 0x128   :  { %875 = vmatpush3.bf16.msra.mxu0 %v936_v8 }
 0x129   :  { %876 = vmatprep.subr.bf16.mxu0 %v1163_v0 }
 0x12c   :  { %877 = vmatpush3.bf16.msra.mxu0 %v937_v9 }
 0x12d   :  { %878 = vmatprep.subr.bf16.mxu0 %v1163_v0 }
 0x130   :  { %879 = vmatpush3.bf16.msra.mxu0 %v938_v10 }
 0x131   :  { %880 = vmatprep.subr.bf16.mxu0 %v1163_v0 }
 0x134   :  { %881 = vmatpush3.bf16.msra.mxu0 %v939_v11 }
 0x135   :  { %882 = vmatprep.subr.bf16.mxu0 %v1163_v0 }
 0x138   :  { %883 = vmatpush3.bf16.msra.mxu0 %v940_v16 }
 0x13b   :  { %885 = vmatmul.mubr.bf16.vlgmr.msra.gmra.mrb[4].mxu0 %v204_v19 }
 0x19c   :  { %v692_v59 = vpop.permute.xlu0 %691 }
 0x19d   :  { %v697_v63 = vpop.permute.xlu1 %696 }
 0x1ee   :  { %v325_v30 = vpop.f32.mrb[0].mxu0 }
 0x1ef   :  { %v326_v31 = vadd.f32 %v756_v29, %v325_v30  ;;  %v846_v32 = vpop.f32.mrb[1].mxu0 }
 0x1f0   :  { %v328_v33 = vpop.f32.mrb[2].mxu0 }
 0x1f1   :  { %v329_v34 = vadd.f32 %v756_v29, %v328_v33  ;;  %v847_v35 = vpop.f32.mrb[3].mxu0  ;;  %v332_v36 = vmax.f32 %v326_v31, 0.0 }
 0x1f3   :  { %v333_v37 = vmax.f32 %v329_v34, 0.0 }
 0x1f5   :  { %v336_v39 = vpack.c.bf16 %v333_v37, %v332_v36 }
 0x1f7   :  { %865 = vmatmul.mubr.bf16.vlgmr.msra.gmra.mrb[0].mxu1 %v336_v39 }
 0x1f8   :  { %889 = vmatpush3.bf16.msra.mxu1 %v949_v38  ;;  %904 = vmatprep.mubr.msk.bf16.mxu1 %vm1164_vm0, %v1163_v0 }
 0x1f9   :  { %890 = vmatprep.subr.bf16.mxu1 %v1163_v0 }
 0x1fc   :  { %891 = vmatpush3.bf16.msra.mxu1 %v950_v40 }
 0x1fd   :  { %892 = vmatprep.subr.bf16.mxu1 %v1163_v0 }
 0x200   :  { %893 = vmatpush3.bf16.msra.mxu1 %v951_v41 }
 0x201   :  { %894 = vmatprep.subr.bf16.mxu1 %v1163_v0 }
 0x204   :  { %895 = vmatpush3.bf16.msra.mxu1 %v952_v42 }
 0x205   :  { %896 = vmatprep.subr.bf16.mxu1 %v1163_v0 }
 0x208   :  { %897 = vmatpush3.bf16.msra.mxu1 %v953_v43 }
 0x209   :  { %898 = vmatprep.subr.bf16.mxu1 %v1163_v0 }
 0x20c   :  { %899 = vmatpush3.bf16.msra.mxu1 %v954_v44 }
 0x20d   :  { %900 = vmatprep.subr.bf16.mxu1 %v1163_v0 }
 0x20e   :  { %v552_v47 = vpop.f32.mrb[4].mxu0 }
 0x20f   :  { %v553_v48 = vadd.f32 %v773_v45, %v552_v47  ;;  %v886_v49 = vpop.f32.mrb[5].mxu0 }
 0x210   :  { %v555_v50 = vpop.f32.mrb[6].mxu0  ;;  %901 = vmatpush3.bf16.msra.mxu1 %v955_v46 }
 0x211   :  { %v556_v52 = vadd.f32 %v773_v45, %v555_v50  ;;  %v887_v53 = vpop.f32.mrb[7].mxu0  ;;  %902 = vmatprep.subr.bf16.mxu1 %v1163_v0  ;;  %v559_v54 = vmax.f32 %v553_v48, 0.0 }
 0x213   :  { %v560_v55 = vmax.f32 %v556_v52, 0.0 }
 0x214   :  { %903 = vmatpush3.bf16.msra.mxu1 %v956_v51 }
 0x215   :  { %v563_v56 = vpack.c.bf16 %v560_v55, %v559_v54 }
 0x217   :  { %905 = vmatmul.mubr.bf16.vlgmr.msra.gmra.mrb[4].mxu1 %v563_v56 }
 0x2ca   :  { %v435_v58 = vpop.f32.mrb[0].mxu1 }
 0x2cb   :  { %v687_v60 = vadd.f32 %v790_v57, %v435_v58  ;;  %v866_v61 = vpop.f32.mrb[1].mxu1 }
 0x2cc   :  { %v438_v62 = vpop.f32.mrb[2].mxu1 }
 0x2cd   :  { %v699_v1 = vmul.f32 %v692_v59, %v687_v60  ;;  %v688_v2 = vadd.f32 %v790_v57, %v438_v62  ;;  %v867_v0 = vpop.f32.mrb[3].mxu1 }
 0x2cf   :  { %701 = vst [vmem:[#allocation18] sm:$0xff] %v699_v1  ;;  %v700_v3 = vmul.f32 %v697_v63, %v688_v2 }
 0x2d1   :  { %702 = vst [vmem:[#allocation18 + $0x8] sm:$0xff] %v700_v3 }
 0x2d2   :  { %1108 = shalt.err (!%p1105_p10)
}
 0x2d3   :  { %s1109_s26 = scalar_lea.hbm %s1440_s10, 256 }
 0x2d4   :  { %p1110_p11 = scmp.ne.s32.totalorder %s1440_s10, %s1109_s26  ;;  %p1113_p12 = scmp.lt.u32.totalorder %s1109_s26, %s1440_s10 }
 0x2d6   :  { %p1115_p13 = pnand %p1113_p12, %p1110_p11 }
 0x2d8   :  { %1118 = shalt.err (!%p1115_p13)
}
 0x2d9   :  { %729 = dma.vmem_to_hbm [thread:$0]  %s724_s21, 256, %s1440_s10, [#allocation9], %s1154_s27, %s1154_s27, %s1155_s28  }
 0x2da   :  { %v791_v4 = vld [vmem:[%s1439_s9] ss:$0 sm:$0xff]  ;;  %s1167_s15 = smov [#allocation19]  }
 0x2db   :  { %s735_s17 = sshll.u32 %s1167_s15, 4  ;;  %s736_s17 = int_to_ptr.vmem [resolvable:$true] %s735_s17 }
 0x2dc   :  { %s1119_s19 = scalar_lea.vmem %s736_s17, 256  ;;  %p1124_p1 = scmp.lt.s32.totalorder %s736_s17, %s736_s17 }
 0x2dd   :  { %p1120_p0 = scmp.ne.s32.totalorder %s736_s17, %s1119_s19  ;;  %p1125_p2 = scmp.lt.s32.totalorder %s1119_s19, %s1119_s19 }
 0x2df   :  { %p1126_p3 = por %p1125_p2, %p1124_p1 }
 0x2e1   :  { %p1127_p4 = pnand %p1126_p3, %p1120_p0 }
 0x2ea   :  { %v662_v5 = vpop.f32.mrb[4].mxu1 }
 0x2eb   :  { %v712_v8 = vadd.f32 %v791_v4, %v662_v5  ;;  %v906_v9 = vpop.f32.mrb[5].mxu1 }
 0x2ec   :  { %v665_v10 = vpop.f32.mrb[6].mxu1 }
 0x2ed   :  { %v714_v11 = vmul.f32 %v712_v8, %v692_v59  ;;  %v713_v12 = vadd.f32 %v791_v4, %v665_v10  ;;  %v907_v13 = vpop.f32.mrb[7].mxu1 }
 0x2ef   :  { %716 = vst [vmem:[#allocation19] sm:$0xff] %v714_v11  ;;  %v715_v14 = vmul.f32 %v713_v12, %v697_v63 }
 0x2f1   :  { %717 = vst [vmem:[#allocation19 + $0x8] sm:$0xff] %v715_v14 }
 0x2f2   :  { %1130 = shalt.err (!%p1127_p4)
}
 0x2f3   :  { %s1131_s20 = scalar_lea.hbm %s1441_s11, 256 }
 0x2f4   :  { %p1132_p5 = scmp.ne.s32.totalorder %s1441_s11, %s1131_s20  ;;  %p1135_p6 = scmp.lt.u32.totalorder %s1131_s20, %s1441_s11 }
 0x2f6   :  { %p1137_p7 = pnand %p1135_p6, %p1132_p5 }
 0x2f8   :  { %1140 = shalt.err (!%p1137_p7)
}
 0x2f9   :  { %741 = dma.vmem_to_hbm [thread:$0]  %s736_s17, 256, %s1441_s11, [#allocation20], %s1154_s27, %s1154_s27, %s1155_s28  }
 0x2fa   :  { %1149 = dma.done.wait [#allocation9], 256  }
 0x2fb   :  { %1150 = vsyncadd [#allocation9], 4294967040 }
 0x2fc   :  { %1151 = dma.done.wait [#allocation20], 256  }
 0x2fd   :  { %1152 = vsyncadd [#allocation20], 4294967040 }
 0x2fe   :  { %748 = vsyncpa [#allocation8], 1 }
 0x2ff   :  { %749 = vsyncpa [#allocation11], 1 }
 0x300   :  { %750 = vsyncpa [#allocation14], 1 }
 0x301   :  { %751 = vsyncpa [#allocation17], 1 }
 0x302   :  { %752 = vsyncpa [#allocation9], 1 }
 0x303   :  { %753 = vsyncpa [#allocation20], 1 }

</bundles_post_ra>
